<compile_context>
chip_gen: v7x
topology: tpu7x:2x2x1
jax: 0.10.0
libtpu: 0.0.40
codegen_flags: <defaults>
</compile_context>

<pallas_src>
import jax
import jax.numpy as jnp
from jax.experimental import pallas as pl
from jax.experimental.pallas import tpu as pltpu

D_IN = 28 * 28          # 784 (full last dim of x -> legal block width)
H = 512
D_OUT = 10
D_OUT_PAD = 128         # lane-dense padded logits width (unmasked vst)

_TILE_CANDIDATES = (512, 256, 128, 64, 32, 16)


def mlp_kernel(x_ref, w1_ref, b1_ref, w2_ref, b2_ref, w3_ref, b3_ref, out_ref):
    # x arrives as f32 straight from HBM; cast to bf16 only for the MXU.
    x = x_ref[...].astype(jnp.bfloat16)
    # Layer 1: (TB, 784) @ (784, 512) + (1, 512), ReLU  (bf16 in, f32 accum)
    h1 = jnp.dot(x, w1_ref[...], preferred_element_type=jnp.float32)
    h1 = jnp.maximum(h1 + b1_ref[...], 0.0).astype(jnp.bfloat16)
    # Layer 2: (TB, 512) @ (512, 512) + (1, 512), ReLU
    h2 = jnp.dot(h1, w2_ref[...], preferred_element_type=jnp.float32)
    h2 = jnp.maximum(h2 + b2_ref[...], 0.0).astype(jnp.bfloat16)
    # Layer 3: (TB, 512) @ (512, 128 padded) + (1, 128 padded)
    logits = jnp.dot(h2, w3_ref[...], preferred_element_type=jnp.float32)
    out_ref[...] = (logits + b3_ref[...]).astype(out_ref.dtype)


def _round_up(n, m):
    return ((n + m - 1) // m) * m


def _num_tensorcores_per_chip():
    """2 for dual-TensorCore chips (v7x / v5p / v4 megacore), else 1."""
    try:
        kind = jax.devices()[0].device_kind.lower()
    except Exception:
        return 1
    if "v7" in kind or "7x" in kind or "v5p" in kind or "v4" in kind:
        return 2
    return 1


def _pick_batch_tile(B, num_cores):
    """MXU-friendly batch tile.

    Single TC: one large tile (>=128 rows when the batch allows, never <16).
    Dual TC:  prefer >=2 grid steps so dimension_semantics=("parallel",) can
    shard the batch across both cores, with ~256-row tiles when B allows.
    Batches that don't divide the tile get zero-row padded by the wrapper, so
    we minimize total padded rows and break ties toward larger tiles.
    """
    B16 = max(16, _round_up(B, 16))          # bf16 sublane packing granularity
    floor = min(128, B16)                    # keep the MXU M dim reasonably full
    if num_cores >= 2 and B16 >= 32:
        floor = max(16, min(floor, B16 // 2))  # allow a split across both TCs

    best_key, best_tile = None, 16
    for t in _TILE_CANDIDATES:
        if t < floor:
            continue
        steps = -(-B16 // t)
        if num_cores >= 2 and steps < 2 and B16 >= 32 and t > 16:
            continue                         # dual-TC: insist on >=2 steps if possible
        key = (steps * t, -t)                # minimize padded rows, prefer larger tile
        if best_key is None or key < best_key:
            best_key, best_tile = key, t
    return best_tile


def mlp_forward(x, kernel_params, *, batch_tile=None):
    """x: (B, 1, 28, 28) float32 (NCHW, like torchvision MNIST).
    kernel_params: from prepare_params().  Returns logits (B, 10) float32."""
    w1, b1, w2, b2, w3, b3 = kernel_params
    B = x.shape[0]

    # Flatten (the nn.Flatten step); x stays f32 — the kernel casts to bf16.
    x_flat = x.reshape(B, -1).astype(jnp.float32)
    assert x_flat.shape[1] == D_IN

    if batch_tile is None:
        batch_tile = _pick_batch_tile(B, _num_tensorcores_per_chip())
    steps = -(-B // batch_tile)
    b_pad = steps * batch_tile
    if b_pad != B:
        x_flat = jnp.pad(x_flat, ((0, b_pad - B), (0, 0)))

    out = pl.pallas_call(
        mlp_kernel,
        out_shape=jax.ShapeDtypeStruct((b_pad, D_OUT_PAD), jnp.bfloat16),
        grid_spec=pltpu.PrefetchScalarGridSpec(
            num_scalar_prefetch=0,
            grid=(steps,),
            in_specs=[
                pl.BlockSpec((batch_tile, D_IN), lambda i: (i, 0)),   # x tile (f32)
                pl.BlockSpec((D_IN, H), lambda i: (0, 0)),            # W1 (bf16, resident)
                pl.BlockSpec((1, H), lambda i: (0, 0)),               # b1 (f32)
                pl.BlockSpec((H, H), lambda i: (0, 0)),               # W2 (bf16)
                pl.BlockSpec((1, H), lambda i: (0, 0)),               # b2 (f32)
                pl.BlockSpec((H, D_OUT_PAD), lambda i: (0, 0)),       # W3 (bf16, padded N)
                pl.BlockSpec((1, D_OUT_PAD), lambda i: (0, 0)),       # b3 (f32, padded N)
            ],
            out_specs=pl.BlockSpec((batch_tile, D_OUT_PAD), lambda i: (i, 0)),
        ),
        compiler_params=pltpu.CompilerParams(
            dimension_semantics=("parallel",),
        ),
    )(x_flat, w1, b1, w2, b2, w3, b3)

    return out[:B, :D_OUT].astype(jnp.float32)


def init_params(key):
    """PyTorch-style (Kaiming-uniform-ish) init, f32.
    Weights stored as (in_features, out_features); biases as (1, out_features)."""
    def linear(k, fan_in, fan_out):
        kw, kb = jax.random.split(k)
        bound = 1.0 / jnp.sqrt(fan_in)
        w = jax.random.uniform(kw, (fan_in, fan_out), jnp.float32, -bound, bound)
        b = jax.random.uniform(kb, (1, fan_out), jnp.float32, -bound, bound)
        return w, b

    k1, k2, k3 = jax.random.split(key, 3)
    w1, b1 = linear(k1, D_IN, H)
    w2, b2 = linear(k2, H, H)
    w3, b3 = linear(k3, H, D_OUT)
    return (w1, b1, w2, b2, w3, b3)


def prepare_params(params):
    """Weights -> bf16 (W3 zero-padded 10 -> 128 columns); biases stay f32
    (b3 zero-padded to 128).  Zero padding is exact for the real 10 logits."""
    w1, b1, w2, b2, w3, b3 = params
    bf = jnp.bfloat16
    w1p = w1.astype(bf)
    w2p = w2.astype(bf)
    w3p = jnp.pad(w3, ((0, 0), (0, D_OUT_PAD - D_OUT))).astype(bf)
    b1p = b1.astype(jnp.float32)
    b2p = b2.astype(jnp.float32)
    b3p = jnp.pad(b3, ((0, 0), (0, D_OUT_PAD - D_OUT))).astype(jnp.float32)
    return (w1p, b1p, w2p, b2p, w3p, b3p)


def mlp_reference(x, params):
    """Pure-JAX reference mimicking the kernel numerics (bf16 in, f32 accum,
    f32 bias+ReLU, bf16 logits store)."""
    w1, b1, w2, b2, w3, b3 = params
    bf = jnp.bfloat16
    h = x.reshape(x.shape[0], -1).astype(bf)
    h = jnp.dot(h, w1.astype(bf), preferred_element_type=jnp.float32)
    h = jnp.maximum(h + b1, 0.0).astype(bf)
    h = jnp.dot(h, w2.astype(bf), preferred_element_type=jnp.float32)
    h = jnp.maximum(h + b2, 0.0).astype(bf)
    out = jnp.dot(h, w3.astype(bf), preferred_element_type=jnp.float32) + b3
    return out.astype(bf).astype(jnp.float32)


if __name__ == "__main__":
    key = jax.random.PRNGKey(0)
    k_params, k_x = jax.random.split(key)

    params = init_params(k_params)
    kernel_params = prepare_params(params)

    # Small batch, NCHW like torchvision MNIST tensors: (B, 1, 28, 28).
    x = jax.random.normal(k_x, (32, 1, 28, 28), dtype=jnp.float32)

    logits = mlp_forward(x, kernel_params)   # tile auto-picked per TPU generation
    logits = jax.block_until_ready(logits)

    ref = mlp_reference(x, params)
    assert logits.shape == (32, 10)
    assert jnp.allclose(logits, ref, atol=2e-2, rtol=2e-2), "mismatch vs reference"

    print("KERNEL_OK")
</pallas_src>

<mosaic_0001>
module attributes {stable_mosaic.version = 11 : i64} {
  func.func @mlp_kernel(%arg0: i32, %arg1: memref<32x784xf32, #tpu.memory_space<vmem>>, %arg2: memref<784x512xbf16, #tpu.memory_space<vmem>>, %arg3: memref<1x512xf32, #tpu.memory_space<vmem>>, %arg4: memref<512x512xbf16, #tpu.memory_space<vmem>>, %arg5: memref<1x512xf32, #tpu.memory_space<vmem>>, %arg6: memref<512x128xbf16, #tpu.memory_space<vmem>>, %arg7: memref<1x128xf32, #tpu.memory_space<vmem>>, %arg8: memref<32x128xbf16, #tpu.memory_space<vmem>>) attributes {dimension_semantics = [#tpu.dimension_semantics<parallel>], iteration_bounds = array<i64: 1>, scalar_prefetch = 0 : i64, scratch_operands = 0 : i64, tpu.core_type = #tpu.core_type<tc>, window_params = [{transform_indices = @transform_0, window_bounds = array<i64: 32, 784>}, {pipeline_mode = #tpu.pipeline_mode<synchronous>, transform_indices = @transform_1, window_bounds = array<i64: 784, 512>}, {pipeline_mode = #tpu.pipeline_mode<synchronous>, transform_indices = @transform_2, window_bounds = array<i64: 1, 512>}, {pipeline_mode = #tpu.pipeline_mode<synchronous>, transform_indices = @transform_3, window_bounds = array<i64: 512, 512>}, {pipeline_mode = #tpu.pipeline_mode<synchronous>, transform_indices = @transform_4, window_bounds = array<i64: 1, 512>}, {pipeline_mode = #tpu.pipeline_mode<synchronous>, transform_indices = @transform_5, window_bounds = array<i64: 512, 128>}, {pipeline_mode = #tpu.pipeline_mode<synchronous>, transform_indices = @transform_6, window_bounds = array<i64: 1, 128>}, {transform_indices = @transform_7, window_bounds = array<i64: 32, 128>}]} {
    %c0 = arith.constant 0 : index
    %c0_0 = arith.constant 0 : index
    %0 = vector.load %arg1[%c0, %c0_0] : memref<32x784xf32, #tpu.memory_space<vmem>>, vector<32x784xf32>
    %1 = arith.truncf %0 : vector<32x784xf32> to vector<32x784xbf16>
    %c0_1 = arith.constant 0 : index
    %c0_2 = arith.constant 0 : index
    %2 = vector.load %arg2[%c0_1, %c0_2] : memref<784x512xbf16, #tpu.memory_space<vmem>>, vector<784x512xbf16>
    %cst = arith.constant dense<0.000000e+00> : vector<32x512xf32>
    %3 = tpu.matmul %1, %2, %cst {dimension_numbers = #tpu.dot_dimension_numbers<[1], [0], [0], [1], [0, 0, 1, 1], [], []>} : vector<32x784xbf16>, vector<784x512xbf16>, vector<32x512xf32> -> vector<32x512xf32>
    %c0_3 = arith.constant 0 : index
    %c0_4 = arith.constant 0 : index
    %4 = vector.load %arg3[%c0_3, %c0_4] : memref<1x512xf32, #tpu.memory_space<vmem>>, vector<1x512xf32>
    %5 = vector.broadcast %4 : vector<1x512xf32> to vector<32x512xf32>
    %6 = arith.addf %3, %5 : vector<32x512xf32>
    %cst_5 = arith.constant 0.000000e+00 : f32
    %7 = vector.broadcast %cst_5 : f32 to vector<32x512xf32>
    %8 = arith.maximumf %6, %7 : vector<32x512xf32>
    %9 = arith.truncf %8 : vector<32x512xf32> to vector<32x512xbf16>
    %c0_6 = arith.constant 0 : index
    %c0_7 = arith.constant 0 : index
    %10 = vector.load %arg4[%c0_6, %c0_7] : memref<512x512xbf16, #tpu.memory_space<vmem>>, vector<512x512xbf16>
    %cst_8 = arith.constant dense<0.000000e+00> : vector<32x512xf32>
    %11 = tpu.matmul %9, %10, %cst_8 {dimension_numbers = #tpu.dot_dimension_numbers<[1], [0], [0], [1], [0, 0, 1, 1], [], []>} : vector<32x512xbf16>, vector<512x512xbf16>, vector<32x512xf32> -> vector<32x512xf32>
    %c0_9 = arith.constant 0 : index
    %c0_10 = arith.constant 0 : index
    %12 = vector.load %arg5[%c0_9, %c0_10] : memref<1x512xf32, #tpu.memory_space<vmem>>, vector<1x512xf32>
    %13 = vector.broadcast %12 : vector<1x512xf32> to vector<32x512xf32>
    %14 = arith.addf %11, %13 : vector<32x512xf32>
    %cst_11 = arith.constant 0.000000e+00 : f32
    %15 = vector.broadcast %cst_11 : f32 to vector<32x512xf32>
    %16 = arith.maximumf %14, %15 : vector<32x512xf32>
    %17 = arith.truncf %16 : vector<32x512xf32> to vector<32x512xbf16>
    %c0_12 = arith.constant 0 : index
    %c0_13 = arith.constant 0 : index
    %18 = vector.load %arg6[%c0_12, %c0_13] : memref<512x128xbf16, #tpu.memory_space<vmem>>, vector<512x128xbf16>
    %cst_14 = arith.constant dense<0.000000e+00> : vector<32x128xf32>
    %19 = tpu.matmul %17, %18, %cst_14 {dimension_numbers = #tpu.dot_dimension_numbers<[1], [0], [0], [1], [0, 0, 1, 1], [], []>} : vector<32x512xbf16>, vector<512x128xbf16>, vector<32x128xf32> -> vector<32x128xf32>
    %c0_15 = arith.constant 0 : index
    %c0_16 = arith.constant 0 : index
    %20 = vector.load %arg7[%c0_15, %c0_16] : memref<1x128xf32, #tpu.memory_space<vmem>>, vector<1x128xf32>
    %21 = vector.broadcast %20 : vector<1x128xf32> to vector<32x128xf32>
    %22 = arith.addf %19, %21 : vector<32x128xf32>
    %23 = arith.truncf %22 : vector<32x128xf32> to vector<32x128xbf16>
    %c0_17 = arith.constant 0 : index
    %c0_18 = arith.constant 0 : index
    %24 = vector.load %arg8[%c0_17, %c0_18] : memref<32x128xbf16, #tpu.memory_space<vmem>>, vector<32x128xbf16>
    tpu.vector_store %arg8[%c0_17, %c0_18], %23 {strides = array<i32>} : memref<32x128xbf16, #tpu.memory_space<vmem>>, vector<32x128xbf16>,
    return
  }
  func.func @transform_0(%arg0: i32) -> (i32, i32) {
    %c0_i32 = arith.constant 0 : i32
    %c0_i32_0 = arith.constant 0 : i32
    return %arg0, %c0_i32 : i32, i32
  }
  func.func @transform_1(%arg0: i32) -> (i32, i32) {
    %c0_i32 = arith.constant 0 : i32
    %c0_i32_0 = arith.constant 0 : i32
    %c0_i32_1 = arith.constant 0 : i32
    return %c0_i32, %c0_i32_0 : i32, i32
  }
  func.func @transform_2(%arg0: i32) -> (i32, i32) {
    %c0_i32 = arith.constant 0 : i32
    %c0_i32_0 = arith.constant 0 : i32
    %c0_i32_1 = arith.constant 0 : i32
    return %c0_i32, %c0_i32_0 : i32, i32
  }
  func.func @transform_3(%arg0: i32) -> (i32, i32) {
    %c0_i32 = arith.constant 0 : i32
    %c0_i32_0 = arith.constant 0 : i32
    %c0_i32_1 = arith.constant 0 : i32
    return %c0_i32, %c0_i32_0 : i32, i32
  }
  func.func @transform_4(%arg0: i32) -> (i32, i32) {
    %c0_i32 = arith.constant 0 : i32
    %c0_i32_0 = arith.constant 0 : i32
    %c0_i32_1 = arith.constant 0 : i32
    return %c0_i32, %c0_i32_0 : i32, i32
  }
  func.func @transform_5(%arg0: i32) -> (i32, i32) {
    %c0_i32 = arith.constant 0 : i32
    %c0_i32_0 = arith.constant 0 : i32
    %c0_i32_1 = arith.constant 0 : i32
    return %c0_i32, %c0_i32_0 : i32, i32
  }
  func.func @transform_6(%arg0: i32) -> (i32, i32) {
    %c0_i32 = arith.constant 0 : i32
    %c0_i32_0 = arith.constant 0 : i32
    %c0_i32_1 = arith.constant 0 : i32
    return %c0_i32, %c0_i32_0 : i32, i32
  }
  func.func @transform_7(%arg0: i32) -> (i32, i32) {
    %c0_i32 = arith.constant 0 : i32
    %c0_i32_0 = arith.constant 0 : i32
    return %arg0, %c0_i32 : i32, i32
  }
}

</mosaic_0001>

<bundles_post_ra>
// kernel: tpu_custom_call.1
= control target key start
LH: loop header
LB: loop body
LE: loop exit
PB: predicated region body
PF: predicated region fallthrough
CT: control target
= control target key end

     0   :  { %12 = vsyncpa [#allocation3], 0  ;;  %s4562_s0 = inlined_call_operand.hbm [shape: f32[32,784], index: 0, kind: input, shape index: {}]   ;;  %s4563_s1 = inlined_call_operand.hbm [shape: bf16[784,512], index: 1, kind: input, shape index: {}]   ;;  %s4564_s2 = inlined_call_operand.vmem [shape: f32[1,512], index: 2, kind: input, shape index: {}]   ;;  %s4565_s3 = inlined_call_operand.hbm [shape: bf16[512,512], index: 3, kind: input, shape index: {}]   ;;  %s4566_s4 = inlined_call_operand.vmem [shape: f32[1,512], index: 4, kind: input, shape index: {}]   ;;  %s4567_s5 = inlined_call_operand.hbm [shape: bf16[512,128], index: 5, kind: input, shape index: {}]   ;;  %s4568_s6 = inlined_call_operand.vmem [shape: f32[1,128], index: 6, kind: input, shape index: {}]   ;;  %s4569_s7 = inlined_call_operand.hbm [shape: bf16[32,128], index: 7, kind: output, shape index: {}]  }
   0x1   :  { %13 = vsyncpa [#allocation6], 0 }
   0x2   :  { %14 = vsyncpa [#allocation9], 0 }
   0x3   :  { %15 = vsyncpa [#allocation4], 0  ;;  %s4384_s24 = smov [#allocation5]   ;;  %s4266_s28 = scalar_lea.hbm %s4563_s1, 25088 }
   0x4   :  { %s33_s25 = sshll.u32 %s4384_s24, 4  ;;  %p4267_p0 = scmp.ne.s32.totalorder %s4563_s1, %s4266_s28  ;;  %s34_s25 = int_to_ptr.vmem [resolvable:$true] %s33_s25 }
   0x5   :  { %p4270_p1 = scmp.lt.u32.totalorder %s4266_s28, %s4563_s1 }
   0x7   :  { %p4272_p2 = pnand %p4270_p1, %p4267_p0 }
   0x9   :  { %4275 = shalt.err (!%p4272_p2)
}
   0xa   :  { %s4276_s10 = scalar_lea.vmem %s34_s25, 25088  ;;  %p4281_p4 = scmp.lt.s32.totalorder %s34_s25, %s34_s25 }
   0xb   :  { %p4277_p3 = scmp.ne.s32.totalorder %s34_s25, %s4276_s10  ;;  %p4282_p5 = scmp.lt.s32.totalorder %s4276_s10, %s4276_s10 }
   0xd   :  { %p4283_p6 = por %p4282_p5, %p4281_p4 }
   0xf   :  { %p4284_p7 = pnand %p4283_p6, %p4277_p3 }
  0x11   :  { %4287 = shalt.err (!%p4284_p7)
}
  0x12   :  { %s4385_s11 = smov 256   ;;  %s4386_s12 = smov 16  }
  0x13   :  { %39 = dma.hbm_to_vmem [thread:$0]  %s4563_s1, 25088, %s34_s25, [#allocation6], %s4385_s11, %s4385_s11, %s4386_s12  }
  0x14   :  { %s4387_s15 = smov [#allocation2]   ;;  %s4288_s19 = scalar_lea.hbm %s4562_s0, 3584 }
  0x15   :  { %s21_s16 = sshll.u32 %s4387_s15, 4  ;;  %p4289_p8 = scmp.ne.s32.totalorder %s4562_s0, %s4288_s19  ;;  %s22_s16 = int_to_ptr.vmem [resolvable:$true] %s21_s16 }
  0x16   :  { %p4292_p9 = scmp.lt.u32.totalorder %s4288_s19, %s4562_s0 }
  0x18   :  { %p4294_p10 = pnand %p4292_p9, %p4289_p8 }
  0x1a   :  { %4297 = shalt.err (!%p4294_p10)
}
  0x1b   :  { %s4298_s24 = scalar_lea.vmem %s22_s16, 3584  ;;  %p4303_p12 = scmp.lt.s32.totalorder %s22_s16, %s22_s16 }
  0x1c   :  { %p4299_p11 = scmp.ne.s32.totalorder %s22_s16, %s4298_s24  ;;  %p4304_p13 = scmp.lt.s32.totalorder %s4298_s24, %s4298_s24 }
  0x1e   :  { %p4305_p0 = por %p4304_p13, %p4303_p12 }
  0x20   :  { %p4306_p1 = pnand %p4305_p0, %p4299_p11 }
  0x22   :  { %4309 = shalt.err (!%p4306_p1)
}
  0x23   :  { %s4388_s1 = smov 896   ;;  %s4389_s25 = smov 56  }
  0x24   :  { %27 = dma.hbm_to_vmem [thread:$0]  %s4562_s0, 3584, %s22_s16, [#allocation3], %s4388_s1, %s4388_s1, %s4389_s25  }
  0x25   :  { %s4390_s28 = smov [#allocation7]   ;;  %s4391_s30 = smov [#allocation8]  }
  0x26   :  { %s47_s29 = sshll.u32 %s4390_s28, 4  ;;  %s61_s8 = sshll.u32 %s4391_s30, 4  ;;  %s48_s29 = int_to_ptr.vmem [resolvable:$true] %s47_s29  ;;  %s4463_s8 = int_to_ptr.vmem [resolvable:$true] %s61_s8 }
  0x27   :  { %s4310_s13 = scalar_lea.hbm %s4565_s3, 16384 }
  0x28   :  { %p4311_p2 = scmp.ne.s32.totalorder %s4565_s3, %s4310_s13  ;;  %p4314_p3 = scmp.lt.u32.totalorder %s4310_s13, %s4565_s3 }
  0x2a   :  { %p4316_p4 = pnand %p4314_p3, %p4311_p2 }
  0x2c   :  { %4319 = shalt.err (!%p4316_p4)
}
  0x2d   :  { %s4320_s0 = scalar_lea.vmem %s48_s29, 16384  ;;  %p4325_p6 = scmp.lt.s32.totalorder %s48_s29, %s48_s29 }
  0x2e   :  { %p4321_p5 = scmp.ne.s32.totalorder %s48_s29, %s4320_s0  ;;  %p4326_p7 = scmp.lt.s32.totalorder %s4320_s0, %s4320_s0 }
  0x30   :  { %p4327_p8 = por %p4326_p7, %p4325_p6 }
  0x32   :  { %p4328_p9 = pnand %p4327_p8, %p4321_p5 }
  0x34   :  { %4331 = shalt.err (!%p4328_p9)
}
  0x35   :  { %53 = dma.hbm_to_vmem [thread:$0]  %s4565_s3, 16384, %s48_s29, [#allocation6], %s4385_s11, %s4385_s11, %s4386_s12  }
  0x36   :  { %s4332_s22 = scalar_lea.hbm %s4567_s5, 4096 }
  0x37   :  { %p4333_p10 = scmp.ne.s32.totalorder %s4567_s5, %s4332_s22  ;;  %p4336_p11 = scmp.lt.u32.totalorder %s4332_s22, %s4567_s5 }
  0x39   :  { %p4338_p12 = pnand %p4336_p11, %p4333_p10 }
  0x3b   :  { %4341 = shalt.err (!%p4338_p12)
}
  0x3c   :  { %s4342_s26 = scalar_lea.vmem %s4463_s8, 4096  ;;  %p4347_p0 = scmp.lt.s32.totalorder %s4463_s8, %s4463_s8 }
  0x3d   :  { %p4343_p13 = scmp.ne.s32.totalorder %s4463_s8, %s4342_s26  ;;  %p4348_p1 = scmp.lt.s32.totalorder %s4342_s26, %s4342_s26 }
  0x3f   :  { %p4349_p2 = por %p4348_p1, %p4347_p0 }
  0x41   :  { %p4350_p3 = pnand %p4349_p2, %p4343_p13 }
  0x43   :  { %4353 = shalt.err (!%p4350_p3)
}
  0x44   :  { %s4392_s3 = smov 64   ;;  %s4393_s11 = smov 4  }
  0x45   :  { %67 = dma.hbm_to_vmem [thread:$0]  %s4567_s5, 4096, %s4463_s8, [#allocation9], %s4392_s3, %s4392_s3, %s4393_s11  }
  0x46   :  { %4376 = dma.done.wait [#allocation3], 3584  }
  0x47   :  { %4377 = vsyncadd [#allocation3], 4294963712 }
  0x48   :  { %4378 = dma.done.wait [#allocation6], 41472  }
  0x49   :  { %4379 = vsyncadd [#allocation6], 4294925824 }
  0x4a   :  { %4380 = dma.done.wait [#allocation9], 4096  }
  0x4b   :  { %4381 = vsyncadd [#allocation9], 4294963200  ;;  %v3748_v0 = vld [vmem:[#allocation5 + $0x4] ss:$16 sps:$4 sm:$0xff]   ;;  %v3750_v1 = vld [vmem:[#allocation5 + $0xc] ss:$16 sps:$4 sm:$0xff]  }
  0x4c   :  { %1330 = vmatprep.subr.bf16.mxu0 %v3748_v0  ;;  %v3752_v2 = vld [vmem:[#allocation5] ss:$16 sps:$4 sm:$0xff]   ;;  %v3753_v3 = vld [vmem:[#allocation5 + $0x8] ss:$16 sps:$4 sm:$0xff]   ;;  %1542 = vmatprep.subr.bf16.mxu1 %v3750_v1  ;;  %v3754_v4 = vld [vmem:[#allocation5 + $0x24] ss:$16 sps:$4 sm:$0xff]  }
  0x4d   :  { %1331 = vmatpush1.bf16.msra.mxu0 %v3752_v2  ;;  %1543 = vmatpush1.bf16.msra.mxu1 %v3753_v3  ;;  %v3756_v5 = vld [vmem:[#allocation5 + $0x2c] ss:$16 sps:$4 sm:$0xff]   ;;  %v3758_v6 = vld [vmem:[#allocation5 + $0x20] ss:$16 sps:$4 sm:$0xff]   ;;  %v3759_v7 = vld [vmem:[#allocation5 + $0x28] ss:$16 sps:$4 sm:$0xff]  }
  0x4e   :  { %1332 = vmatprep.subr.bf16.mxu0 %v3754_v4  ;;  %1544 = vmatprep.subr.bf16.mxu1 %v3756_v5  ;;  %v3760_v8 = vld [vmem:[#allocation5 + $0x44] ss:$16 sps:$4 sm:$0xff]   ;;  %v3762_v9 = vld [vmem:[#allocation5 + $0x4c] ss:$16 sps:$4 sm:$0xff]   ;;  %v3764_v10 = vld [vmem:[#allocation5 + $0x40] ss:$16 sps:$4 sm:$0xff]  }
  0x4f   :  { %v3765_v11 = vld [vmem:[#allocation5 + $0x48] ss:$16 sps:$4 sm:$0xff]   ;;  %v3766_v12 = vld [vmem:[#allocation5 + $0x64] ss:$16 sps:$4 sm:$0xff]   ;;  %v3768_v13 = vld [vmem:[#allocation5 + $0x6c] ss:$16 sps:$4 sm:$0xff]  }
  0x50   :  { %v3770_v14 = vld [vmem:[#allocation5 + $0x60] ss:$16 sps:$4 sm:$0xff]   ;;  %v3771_v15 = vld [vmem:[#allocation5 + $0x68] ss:$16 sps:$4 sm:$0xff]   ;;  %v3772_v16 = vld [vmem:[#allocation5 + $0x84] ss:$16 sps:$4 sm:$0xff]  }
  0x51   :  { %1333 = vmatpush1.bf16.msra.mxu0 %v3758_v6  ;;  %1545 = vmatpush1.bf16.msra.mxu1 %v3759_v7  ;;  %v3774_v17 = vld [vmem:[#allocation5 + $0x8c] ss:$16 sps:$4 sm:$0xff]   ;;  %v3776_v18 = vld [vmem:[#allocation5 + $0x80] ss:$16 sps:$4 sm:$0xff]   ;;  %v3777_v19 = vld [vmem:[#allocation5 + $0x88] ss:$16 sps:$4 sm:$0xff]  }
  0x52   :  { %1334 = vmatprep.subr.bf16.mxu0 %v3760_v8  ;;  %1546 = vmatprep.subr.bf16.mxu1 %v3762_v9  ;;  %v3778_v20 = vld [vmem:[#allocation5 + $0xa4] ss:$16 sps:$4 sm:$0xff]   ;;  %v3780_v21 = vld [vmem:[#allocation5 + $0xac] ss:$16 sps:$4 sm:$0xff]   ;;  %v3782_v22 = vld [vmem:[#allocation5 + $0xa0] ss:$16 sps:$4 sm:$0xff]  }
  0x53   :  { %v3783_v23 = vld [vmem:[#allocation5 + $0xa8] ss:$16 sps:$4 sm:$0xff]   ;;  %v3784_v24 = vld [vmem:[#allocation5 + $0xc4] ss:$16 sps:$4 sm:$0xff]   ;;  %v3786_v25 = vld [vmem:[#allocation5 + $0xcc] ss:$16 sps:$4 sm:$0xff]  }
  0x54   :  { %v3788_v26 = vld [vmem:[#allocation5 + $0xc0] ss:$16 sps:$4 sm:$0xff]   ;;  %v3789_v27 = vld [vmem:[#allocation5 + $0xc8] ss:$16 sps:$4 sm:$0xff]   ;;  %v3790_v28 = vld [vmem:[#allocation5 + $0xe4] ss:$16 sps:$4 sm:$0xff]  }
  0x55   :  { %1335 = vmatpush1.bf16.msra.mxu0 %v3764_v10  ;;  %1547 = vmatpush1.bf16.msra.mxu1 %v3765_v11  ;;  %v3792_v29 = vld [vmem:[#allocation5 + $0xec] ss:$16 sps:$4 sm:$0xff]   ;;  %v3794_v30 = vld [vmem:[#allocation5 + $0xe0] ss:$16 sps:$4 sm:$0xff]   ;;  %v3795_v31 = vld [vmem:[#allocation5 + $0xe8] ss:$16 sps:$4 sm:$0xff]  }
  0x56   :  { %1336 = vmatprep.subr.bf16.mxu0 %v3766_v12  ;;  %1548 = vmatprep.subr.bf16.mxu1 %v3768_v13  ;;  %v3796_v32 = vld [vmem:[#allocation5 + $0x104] ss:$16 sps:$4 sm:$0xff]   ;;  %v3798_v33 = vld [vmem:[#allocation5 + $0x10c] ss:$16 sps:$4 sm:$0xff]   ;;  %v3800_v34 = vld [vmem:[#allocation5 + $0x100] ss:$16 sps:$4 sm:$0xff]  }
  0x57   :  { %v3801_v35 = vld [vmem:[#allocation5 + $0x108] ss:$16 sps:$4 sm:$0xff]   ;;  %v3802_v36 = vld [vmem:[#allocation5 + $0x124] ss:$16 sps:$4 sm:$0xff]   ;;  %v3804_v37 = vld [vmem:[#allocation5 + $0x12c] ss:$16 sps:$4 sm:$0xff]  }
  0x58   :  { %v3806_v38 = vld [vmem:[#allocation5 + $0x120] ss:$16 sps:$4 sm:$0xff]   ;;  %v3807_v39 = vld [vmem:[#allocation5 + $0x128] ss:$16 sps:$4 sm:$0xff]   ;;  %v3808_v40 = vld [vmem:[#allocation5 + $0x144] ss:$16 sps:$4 sm:$0xff]  }
  0x59   :  { %1337 = vmatpush1.bf16.msra.mxu0 %v3770_v14  ;;  %1549 = vmatpush1.bf16.msra.mxu1 %v3771_v15  ;;  %v3810_v41 = vld [vmem:[#allocation5 + $0x14c] ss:$16 sps:$4 sm:$0xff]   ;;  %v3812_v42 = vld [vmem:[#allocation5 + $0x140] ss:$16 sps:$4 sm:$0xff]   ;;  %v3813_v43 = vld [vmem:[#allocation5 + $0x148] ss:$16 sps:$4 sm:$0xff]  }
  0x5a   :  { %1338 = vmatprep.subr.bf16.mxu0 %v3772_v16  ;;  %1550 = vmatprep.subr.bf16.mxu1 %v3774_v17  ;;  %v3814_v44 = vld [vmem:[#allocation5 + $0x164] ss:$16 sps:$4 sm:$0xff]   ;;  %v3816_v45 = vld [vmem:[#allocation5 + $0x16c] ss:$16 sps:$4 sm:$0xff]   ;;  %v3818_v48 = vld [vmem:[#allocation5 + $0x160] ss:$16 sps:$4 sm:$0xff]  }
  0x5b   :  { %v84_v46 = vld [vmem:[#allocation2 + $0x8] sm:$0xff]  ;;  %v91_v47 = vld [vmem:[#allocation2 + $0x40] sm:$0xff]  ;;  %v90_v5 = vld [vmem:[#allocation2 + $0x38] sm:$0xff]  ;;  %vm1323_vm0 = vcmask 130048  }
  0x5c   :  { %v3819_v49 = vld [vmem:[#allocation5 + $0x168] ss:$16 sps:$4 sm:$0xff]   ;;  %v112_v50 = vpack.c.bf16 %v91_v47, %v84_v46  ;;  %v3820_v51 = vld [vmem:[#allocation5 + $0x184] ss:$16 sps:$4 sm:$0xff]   ;;  %v3822_v52 = vld [vmem:[#allocation5 + $0x18c] ss:$16 sps:$4 sm:$0xff]  }
  0x5d   :  { %1339 = vmatpush1.bf16.msra.mxu0 %v3776_v18  ;;  %1551 = vmatpush1.bf16.msra.mxu1 %v3777_v19  ;;  %v3824_v53 = vld [vmem:[#allocation5 + $0x180] ss:$16 sps:$4 sm:$0xff]   ;;  %v3825_v54 = vld [vmem:[#allocation5 + $0x188] ss:$16 sps:$4 sm:$0xff]   ;;  %v3826_v55 = vld [vmem:[#allocation5 + $0x1a4] ss:$16 sps:$4 sm:$0xff]  }
  0x5e   :  { %1340 = vmatprep.subr.bf16.mxu0 %v3778_v20  ;;  %1552 = vmatprep.subr.bf16.mxu1 %v3780_v21  ;;  %v3828_v56 = vld [vmem:[#allocation5 + $0x1ac] ss:$16 sps:$4 sm:$0xff]   ;;  %v3830_v57 = vld [vmem:[#allocation5 + $0x1a0] ss:$16 sps:$4 sm:$0xff]   ;;  %v3831_v58 = vld [vmem:[#allocation5 + $0x1a8] ss:$16 sps:$4 sm:$0xff]  }
  0x5f   :  { %1362 = vmatprep.mubr.bf16.mxu0 %v112_v50  ;;  %1574 = vmatprep.mubr.bf16.mxu1 %v112_v50  ;;  %v3832_v59 = vld [vmem:[#allocation5 + $0x1c4] ss:$16 sps:$4 sm:$0xff]   ;;  %v3834_v60 = vld [vmem:[#allocation5 + $0x1cc] ss:$16 sps:$4 sm:$0xff]   ;;  %v3836_v61 = vld [vmem:[#allocation5 + $0x1c0] ss:$16 sps:$4 sm:$0xff]  }
  0x60   :  { %v3837_v62 = vld [vmem:[#allocation5 + $0x1c8] ss:$16 sps:$4 sm:$0xff]   ;;  %v3838_v63 = vld [vmem:[#allocation5 + $0x1e4] ss:$16 sps:$4 sm:$0xff]   ;;  %v3840_v0 = vld [vmem:[#allocation5 + $0x1ec] ss:$16 sps:$4 sm:$0xff]  }
  0x61   :  { %1341 = vmatpush1.bf16.msra.mxu0 %v3782_v22  ;;  %1553 = vmatpush1.bf16.msra.mxu1 %v3783_v23  ;;  %v3842_v1 = vld [vmem:[#allocation5 + $0x1e0] ss:$16 sps:$4 sm:$0xff]   ;;  %v3843_v2 = vld [vmem:[#allocation5 + $0x1e8] ss:$16 sps:$4 sm:$0xff]   ;;  %v3846_v3 = vld [vmem:[#allocation5 + $0x204] ss:$16 sps:$4 sm:$0xff]  }
  0x62   :  { %1342 = vmatprep.subr.bf16.mxu0 %v3784_v24  ;;  %1554 = vmatprep.subr.bf16.mxu1 %v3786_v25  ;;  %v83_v4 = vld [vmem:[#allocation2] sm:$0xff]  ;;  %v3849_v6 = vld [vmem:[#allocation5 + $0x20c] ss:$16 sps:$4 sm:$0xff]   ;;  %v3847_v8 = vld [vmem:[#allocation5 + $0x208] ss:$16 sps:$4 sm:$0xff]  }
  0x63   :  { %v3844_v7 = vld [vmem:[#allocation5 + $0x200] ss:$16 sps:$4 sm:$0xff]   ;;  %v111_v9 = vpack.c.bf16 %v90_v5, %v83_v4  ;;  %v3852_v10 = vld [vmem:[#allocation5 + $0x224] ss:$16 sps:$4 sm:$0xff]   ;;  %v3855_v11 = vld [vmem:[#allocation5 + $0x22c] ss:$16 sps:$4 sm:$0xff]  }
  0x64   :  { %v3850_v12 = vld [vmem:[#allocation5 + $0x220] ss:$16 sps:$4 sm:$0xff]   ;;  %v3853_v13 = vld [vmem:[#allocation5 + $0x228] ss:$16 sps:$4 sm:$0xff]   ;;  %v3858_v14 = vld [vmem:[#allocation5 + $0x244] ss:$16 sps:$4 sm:$0xff]  }
  0x65   :  { %1343 = vmatpush1.bf16.msra.mxu0 %v3788_v26  ;;  %1555 = vmatpush1.bf16.msra.mxu1 %v3789_v27  ;;  %v3861_v15 = vld [vmem:[#allocation5 + $0x24c] ss:$16 sps:$4 sm:$0xff]   ;;  %v3856_v16 = vld [vmem:[#allocation5 + $0x240] ss:$16 sps:$4 sm:$0xff]   ;;  %v3859_v17 = vld [vmem:[#allocation5 + $0x248] ss:$16 sps:$4 sm:$0xff]  }
  0x66   :  { %1344 = vmatprep.subr.bf16.mxu0 %v3790_v28  ;;  %1556 = vmatprep.subr.bf16.mxu1 %v3792_v29  ;;  %v3864_v18 = vld [vmem:[#allocation5 + $0x264] ss:$16 sps:$4 sm:$0xff]   ;;  %v3867_v19 = vld [vmem:[#allocation5 + $0x26c] ss:$16 sps:$4 sm:$0xff]   ;;  %v3862_v20 = vld [vmem:[#allocation5 + $0x260] ss:$16 sps:$4 sm:$0xff]  }
  0x67   :  { %v3865_v21 = vld [vmem:[#allocation5 + $0x268] ss:$16 sps:$4 sm:$0xff]   ;;  %v3870_v22 = vld [vmem:[#allocation5 + $0x284] ss:$16 sps:$4 sm:$0xff]   ;;  %v3873_v23 = vld [vmem:[#allocation5 + $0x28c] ss:$16 sps:$4 sm:$0xff]  }
  0x68   :  { %v3868_v24 = vld [vmem:[#allocation5 + $0x280] ss:$16 sps:$4 sm:$0xff]   ;;  %v3871_v25 = vld [vmem:[#allocation5 + $0x288] ss:$16 sps:$4 sm:$0xff]   ;;  %v3876_v26 = vld [vmem:[#allocation5 + $0x2a4] ss:$16 sps:$4 sm:$0xff]  }
  0x69   :  { %1345 = vmatpush1.bf16.msra.mxu0 %v3794_v30  ;;  %1557 = vmatpush1.bf16.msra.mxu1 %v3795_v31  ;;  %v3879_v27 = vld [vmem:[#allocation5 + $0x2ac] ss:$16 sps:$4 sm:$0xff]   ;;  %v105_v29 = vld [vmem:[#allocation2 + $0xb0] sm:$0xff]  ;;  %v3889_v46 = vld [vmem:[#allocation5 + $0x2e8] ss:$16 sps:$4 sm:$0xff]  }
  0x6a   :  { %1346 = vmatprep.subr.bf16.mxu0 %v3796_v32  ;;  %1558 = vmatprep.subr.bf16.mxu1 %v3798_v33  ;;  %v98_v28 = vld [vmem:[#allocation2 + $0x78] sm:$0xff]  ;;  %v3874_v30 = vld [vmem:[#allocation5 + $0x2a0] ss:$16 sps:$4 sm:$0xff]   ;;  %v3882_v33 = vld [vmem:[#allocation5 + $0x2c4] ss:$16 sps:$4 sm:$0xff]  }
  0x6b   :  { %v119_v31 = vpack.c.bf16 %v105_v29, %v98_v28  ;;  %v3877_v32 = vld [vmem:[#allocation5 + $0x2a8] ss:$16 sps:$4 sm:$0xff]   ;;  %v3894_v47 = vld [vmem:[#allocation5 + $0x304] ss:$16 sps:$4 sm:$0xff]   ;;  %v3927_v4 = vld [vmem:[#allocation5 + $0x3ac] ss:$16 sps:$4 sm:$0xff]  }
  0x6c   :  { %v3895_v50 = vld [vmem:[#allocation5 + $0x308] ss:$16 sps:$4 sm:$0xff]   ;;  %v3922_v5 = vld [vmem:[#allocation5 + $0x3a0] ss:$16 sps:$4 sm:$0xff]  }
  0x6d   :  { %1347 = vmatpush1.bf16.msra.mxu0 %v3800_v34  ;;  %1559 = vmatpush1.bf16.msra.mxu1 %v3801_v35  ;;  %v3885_v34 = vld [vmem:[#allocation5 + $0x2cc] ss:$16 sps:$4 sm:$0xff]   ;;  %v97_v35 = vld [vmem:[#allocation2 + $0x70] sm:$0xff]  ;;  %v3949_v28 = vld [vmem:[#allocation5 + $0x428] ss:$16 sps:$4 sm:$0xff]  }
  0x6e   :  { %1348 = vmatprep.subr.bf16.mxu0 %v3802_v36  ;;  %1560 = vmatprep.subr.bf16.mxu1 %v3804_v37  ;;  %v104_v36 = vld [vmem:[#allocation2 + $0xa8] sm:$0xff]  ;;  %v99_v29 = vld [vmem:[#allocation2 + $0x80] sm:$0xff] }
  0x6f   :  { %v118_v37 = vpack.c.bf16 %v104_v36, %v97_v35  ;;  %v95_v35 = vld [vmem:[#allocation2 + $0x60] sm:$0xff] }
  0x70   :  { %v3952_v36 = vld [vmem:[#allocation5 + $0x440] ss:$16 sps:$4 sm:$0xff]  }
  0x71   :  { %1349 = vmatpush1.bf16.msra.mxu0 %v3806_v38  ;;  %1561 = vmatpush1.bf16.msra.mxu1 %v3807_v39  ;;  %v3880_v38 = vld [vmem:[#allocation5 + $0x2c0] ss:$16 sps:$4 sm:$0xff]   ;;  %v3883_v39 = vld [vmem:[#allocation5 + $0x2c8] ss:$16 sps:$4 sm:$0xff]  }
  0x72   :  { %1350 = vmatprep.subr.bf16.mxu0 %v3808_v40  ;;  %1562 = vmatprep.subr.bf16.mxu1 %v3810_v41  ;;  %v86_v40 = vld [vmem:[#allocation2 + $0x18] sm:$0xff]  ;;  %v93_v41 = vld [vmem:[#allocation2 + $0x50] sm:$0xff] }
  0x75   :  { %1351 = vmatpush1.bf16.msra.mxu0 %v3812_v42  ;;  %1563 = vmatpush1.bf16.msra.mxu1 %v3813_v43  ;;  %v3888_v42 = vld [vmem:[#allocation5 + $0x2e4] ss:$16 sps:$4 sm:$0xff]   ;;  %v3891_v43 = vld [vmem:[#allocation5 + $0x2ec] ss:$16 sps:$4 sm:$0xff]  }
  0x76   :  { %1352 = vmatprep.subr.bf16.mxu0 %v3814_v44  ;;  %1564 = vmatprep.subr.bf16.mxu1 %v3816_v45  ;;  %v114_v44 = vpack.c.bf16 %v93_v41, %v86_v40  ;;  %v3886_v45 = vld [vmem:[#allocation5 + $0x2e0] ss:$16 sps:$4 sm:$0xff]  }
  0x77   :  { %v3958_v41 = vld [vmem:[#allocation5 + $0x460] ss:$16 sps:$4 sm:$0xff]  }
  0x79   :  { %1353 = vmatpush1.bf16.msra.mxu0 %v3818_v48  ;;  %1565 = vmatpush1.bf16.msra.mxu1 %v3819_v49  ;;  %v3897_v48 = vld [vmem:[#allocation5 + $0x30c] ss:$16 sps:$4 sm:$0xff]   ;;  %v3892_v49 = vld [vmem:[#allocation5 + $0x300] ss:$16 sps:$4 sm:$0xff]  }
  0x7a   :  { %1354 = vmatprep.subr.bf16.mxu0 %v3820_v51  ;;  %1566 = vmatprep.subr.bf16.mxu1 %v3822_v52  ;;  %v3900_v51 = vld [vmem:[#allocation5 + $0x324] ss:$16 sps:$4 sm:$0xff]   ;;  %v3903_v52 = vld [vmem:[#allocation5 + $0x32c] ss:$16 sps:$4 sm:$0xff]  }
  0x7d   :  { %1355 = vmatpush1.bf16.msra.mxu0 %v3824_v53  ;;  %1567 = vmatpush1.bf16.msra.mxu1 %v3825_v54  ;;  %v3898_v53 = vld [vmem:[#allocation5 + $0x320] ss:$16 sps:$4 sm:$0xff]   ;;  %v3901_v54 = vld [vmem:[#allocation5 + $0x328] ss:$16 sps:$4 sm:$0xff]  }
  0x7e   :  { %1356 = vmatprep.subr.bf16.mxu0 %v3826_v55  ;;  %1568 = vmatprep.subr.bf16.mxu1 %v3828_v56  ;;  %v3906_v55 = vld [vmem:[#allocation5 + $0x344] ss:$16 sps:$4 sm:$0xff]   ;;  %v3909_v56 = vld [vmem:[#allocation5 + $0x34c] ss:$16 sps:$4 sm:$0xff]  }
  0x81   :  { %1357 = vmatpush1.bf16.msra.mxu0 %v3830_v57  ;;  %1569 = vmatpush1.bf16.msra.mxu1 %v3831_v58  ;;  %v3904_v57 = vld [vmem:[#allocation5 + $0x340] ss:$16 sps:$4 sm:$0xff]   ;;  %v3907_v58 = vld [vmem:[#allocation5 + $0x348] ss:$16 sps:$4 sm:$0xff]  }
  0x82   :  { %1358 = vmatprep.subr.bf16.mxu0 %v3832_v59  ;;  %1570 = vmatprep.subr.bf16.mxu1 %v3834_v60  ;;  %v3912_v59 = vld [vmem:[#allocation5 + $0x364] ss:$16 sps:$4 sm:$0xff]   ;;  %v3915_v60 = vld [vmem:[#allocation5 + $0x36c] ss:$16 sps:$4 sm:$0xff]  }
  0x85   :  { %1359 = vmatpush1.bf16.msra.mxu0 %v3836_v61  ;;  %1571 = vmatpush1.bf16.msra.mxu1 %v3837_v62  ;;  %v3910_v61 = vld [vmem:[#allocation5 + $0x360] ss:$16 sps:$4 sm:$0xff]   ;;  %v3913_v62 = vld [vmem:[#allocation5 + $0x368] ss:$16 sps:$4 sm:$0xff]  }
  0x86   :  { %1360 = vmatprep.subr.bf16.mxu0 %v3838_v63  ;;  %1572 = vmatprep.subr.bf16.mxu1 %v3840_v0  ;;  %v3918_v63 = vld [vmem:[#allocation5 + $0x384] ss:$16 sps:$4 sm:$0xff]   ;;  %v3921_v0 = vld [vmem:[#allocation5 + $0x38c] ss:$16 sps:$4 sm:$0xff]  }
  0x89   :  { %1361 = vmatpush1.bf16.msra.mxu0 %v3842_v1  ;;  %1573 = vmatpush1.bf16.msra.mxu1 %v3843_v2  ;;  %v3916_v1 = vld [vmem:[#allocation5 + $0x380] ss:$16 sps:$4 sm:$0xff]   ;;  %v3919_v2 = vld [vmem:[#allocation5 + $0x388] ss:$16 sps:$4 sm:$0xff]  }
  0x8a   :  { %1383 = vmatprep.subr.bf16.mxu0 %v3846_v3  ;;  %1595 = vmatprep.subr.bf16.mxu1 %v3849_v6  ;;  %v3924_v3 = vld [vmem:[#allocation5 + $0x3a4] ss:$16 sps:$4 sm:$0xff]   ;;  %v3925_v6 = vld [vmem:[#allocation5 + $0x3a8] ss:$16 sps:$4 sm:$0xff]  }
  0x8c   :  { %1363 = vmatmul.mubr.bf16.vlgmr.msra.gmra.mrb[0].mxu0 %v111_v9  ;;  %1575 = vmatmul.mubr.bf16.vlgmr.msra.gmra.mrb[0].mxu1 %v111_v9  ;;  %v3928_v9 = vld [vmem:[#allocation5 + $0x3c0] ss:$16 sps:$4 sm:$0xff]  }
  0x8d   :  { %1384 = vmatpush1.bf16.msra.mxu0 %v3844_v7  ;;  %1596 = vmatpush1.bf16.msra.mxu1 %v3847_v8  ;;  %v3930_v7 = vld [vmem:[#allocation5 + $0x3c4] ss:$16 sps:$4 sm:$0xff]   ;;  %v3933_v8 = vld [vmem:[#allocation5 + $0x3cc] ss:$16 sps:$4 sm:$0xff]  }
  0x8e   :  { %1385 = vmatprep.subr.bf16.mxu0 %v3852_v10  ;;  %1597 = vmatprep.subr.bf16.mxu1 %v3855_v11  ;;  %v3931_v10 = vld [vmem:[#allocation5 + $0x3c8] ss:$16 sps:$4 sm:$0xff]   ;;  %v3936_v11 = vld [vmem:[#allocation5 + $0x3e4] ss:$16 sps:$4 sm:$0xff]  }
  0x8f   :  { %1372 = vmatprep.mubr.bf16.mxu0 %v119_v31  ;;  %1584 = vmatprep.mubr.bf16.mxu1 %v119_v31  ;;  %v3954_v31 = vld [vmem:[#allocation5 + $0x444] ss:$16 sps:$4 sm:$0xff]  }
  0x91   :  { %1386 = vmatpush1.bf16.msra.mxu0 %v3850_v12  ;;  %1598 = vmatpush1.bf16.msra.mxu1 %v3853_v13  ;;  %v3939_v12 = vld [vmem:[#allocation5 + $0x3ec] ss:$16 sps:$4 sm:$0xff]   ;;  %v3934_v13 = vld [vmem:[#allocation5 + $0x3e0] ss:$16 sps:$4 sm:$0xff]  }
  0x92   :  { %1387 = vmatprep.subr.bf16.mxu0 %v3858_v14  ;;  %1599 = vmatprep.subr.bf16.mxu1 %v3861_v15  ;;  %v3937_v14 = vld [vmem:[#allocation5 + $0x3e8] ss:$16 sps:$4 sm:$0xff]   ;;  %v3942_v15 = vld [vmem:[#allocation5 + $0x404] ss:$16 sps:$4 sm:$0xff]  }
  0x94   :  { %1373 = vmatmul.mubr.bf16.gmra.mrb[4].mxu0 %v118_v37  ;;  %1585 = vmatmul.mubr.bf16.gmra.mrb[4].mxu1 %v118_v37  ;;  %v3955_v37 = vld [vmem:[#allocation5 + $0x448] ss:$16 sps:$4 sm:$0xff]  }
  0x95   :  { %1388 = vmatpush1.bf16.msra.mxu0 %v3856_v16  ;;  %1600 = vmatpush1.bf16.msra.mxu1 %v3859_v17  ;;  %v85_v16 = vld [vmem:[#allocation2 + $0x10] sm:$0xff]  ;;  %v92_v17 = vld [vmem:[#allocation2 + $0x48] sm:$0xff] }
  0x96   :  { %1389 = vmatprep.subr.bf16.mxu0 %v3864_v18  ;;  %1601 = vmatprep.subr.bf16.mxu1 %v3867_v19  ;;  %v3945_v18 = vld [vmem:[#allocation5 + $0x40c] ss:$16 sps:$4 sm:$0xff]   ;;  %v3940_v19 = vld [vmem:[#allocation5 + $0x400] ss:$16 sps:$4 sm:$0xff]  }
  0x97   :  { %1415 = vmatprep.mubr.bf16.mxu0 %v114_v44  ;;  %1627 = vmatprep.mubr.bf16.mxu1 %v114_v44  ;;  %v3969_v44 = vld [vmem:[#allocation5 + $0x48c] ss:$16 sps:$4 sm:$0xff]  }
  0x99   :  { %1390 = vmatpush1.bf16.msra.mxu0 %v3862_v20  ;;  %1602 = vmatpush1.bf16.msra.mxu1 %v3865_v21  ;;  %v3943_v20 = vld [vmem:[#allocation5 + $0x408] ss:$16 sps:$4 sm:$0xff]   ;;  %v113_v21 = vpack.c.bf16 %v92_v17, %v85_v16  ;;  %v4023_v16 = vld [vmem:[#allocation5 + $0x5ac] ss:$16 sps:$4 sm:$0xff]   ;;  %v4018_v17 = vld [vmem:[#allocation5 + $0x5a0] ss:$16 sps:$4 sm:$0xff]  }
  0x9a   :  { %1391 = vmatprep.subr.bf16.mxu0 %v3870_v22  ;;  %1603 = vmatprep.subr.bf16.mxu1 %v3873_v23  ;;  %v100_v22 = vld [vmem:[#allocation2 + $0x88] sm:$0xff]  ;;  %v107_v23 = vld [vmem:[#allocation2 + $0xc0] sm:$0xff] }
  0x9d   :  { %1392 = vmatpush1.bf16.msra.mxu0 %v3868_v24  ;;  %1604 = vmatpush1.bf16.msra.mxu1 %v3871_v25  ;;  %v3948_v24 = vld [vmem:[#allocation5 + $0x424] ss:$16 sps:$4 sm:$0xff]   ;;  %v3951_v25 = vld [vmem:[#allocation5 + $0x42c] ss:$16 sps:$4 sm:$0xff]  }
  0x9e   :  { %1393 = vmatprep.subr.bf16.mxu0 %v3876_v26  ;;  %1605 = vmatprep.subr.bf16.mxu1 %v3879_v27  ;;  %v3946_v26 = vld [vmem:[#allocation5 + $0x420] ss:$16 sps:$4 sm:$0xff]   ;;  %v121_v27 = vpack.c.bf16 %v107_v23, %v100_v22  ;;  %v4027_v22 = vld [vmem:[#allocation5 + $0x5c8] ss:$16 sps:$4 sm:$0xff]   ;;  %v4032_v23 = vld [vmem:[#allocation5 + $0x5e4] ss:$16 sps:$4 sm:$0xff]  }
  0xa1   :  { %1394 = vmatpush1.bf16.msra.mxu0 %v3874_v30  ;;  %1606 = vmatpush1.bf16.msra.mxu1 %v3877_v32  ;;  %v106_v30 = vld [vmem:[#allocation2 + $0xb8] sm:$0xff] }
  0xa2   :  { %1395 = vmatprep.subr.bf16.mxu0 %v3882_v33  ;;  %1607 = vmatprep.subr.bf16.mxu1 %v3885_v34  ;;  %v3957_v32 = vld [vmem:[#allocation5 + $0x44c] ss:$16 sps:$4 sm:$0xff]   ;;  %v120_v33 = vpack.c.bf16 %v106_v30, %v99_v29  ;;  %v4038_v29 = vld [vmem:[#allocation5 + $0x604] ss:$16 sps:$4 sm:$0xff]  }
  0xa3   :  { %v88_v34 = vld [vmem:[#allocation2 + $0x28] sm:$0xff]  ;;  %v102_v30 = vld [vmem:[#allocation2 + $0x98] sm:$0xff] }
  0xa4   :  { %v116_v40 = vpack.c.bf16 %v95_v35, %v88_v34  ;;  %v4039_v35 = vld [vmem:[#allocation5 + $0x608] ss:$16 sps:$4 sm:$0xff]  }
  0xa5   :  { %1396 = vmatpush1.bf16.msra.mxu0 %v3880_v38  ;;  %1608 = vmatpush1.bf16.msra.mxu1 %v3883_v39  ;;  %v3960_v38 = vld [vmem:[#allocation5 + $0x464] ss:$16 sps:$4 sm:$0xff]   ;;  %v3963_v39 = vld [vmem:[#allocation5 + $0x46c] ss:$16 sps:$4 sm:$0xff]  }
  0xa6   :  { %1397 = vmatprep.subr.bf16.mxu0 %v3888_v42  ;;  %1609 = vmatprep.subr.bf16.mxu1 %v3891_v43  ;;  %v3961_v42 = vld [vmem:[#allocation5 + $0x468] ss:$16 sps:$4 sm:$0xff]   ;;  %v3966_v43 = vld [vmem:[#allocation5 + $0x484] ss:$16 sps:$4 sm:$0xff]  }
  0xa9   :  { %1398 = vmatpush1.bf16.msra.mxu0 %v3886_v45  ;;  %1610 = vmatpush1.bf16.msra.mxu1 %v3889_v46  ;;  %v3964_v45 = vld [vmem:[#allocation5 + $0x480] ss:$16 sps:$4 sm:$0xff]   ;;  %v3967_v46 = vld [vmem:[#allocation5 + $0x488] ss:$16 sps:$4 sm:$0xff]  }
  0xaa   :  { %1399 = vmatprep.subr.bf16.mxu0 %v3894_v47  ;;  %1611 = vmatprep.subr.bf16.mxu1 %v3897_v48  ;;  %v3972_v47 = vld [vmem:[#allocation5 + $0x4a4] ss:$16 sps:$4 sm:$0xff]   ;;  %v3975_v48 = vld [vmem:[#allocation5 + $0x4ac] ss:$16 sps:$4 sm:$0xff]  }
  0xad   :  { %1400 = vmatpush1.bf16.msra.mxu0 %v3892_v49  ;;  %1612 = vmatpush1.bf16.msra.mxu1 %v3895_v50  ;;  %v3970_v49 = vld [vmem:[#allocation5 + $0x4a0] ss:$16 sps:$4 sm:$0xff]   ;;  %v3973_v50 = vld [vmem:[#allocation5 + $0x4a8] ss:$16 sps:$4 sm:$0xff]  }
  0xae   :  { %1401 = vmatprep.subr.bf16.mxu0 %v3900_v51  ;;  %1613 = vmatprep.subr.bf16.mxu1 %v3903_v52  ;;  %v3978_v51 = vld [vmem:[#allocation5 + $0x4c4] ss:$16 sps:$4 sm:$0xff]   ;;  %v3981_v52 = vld [vmem:[#allocation5 + $0x4cc] ss:$16 sps:$4 sm:$0xff]  }
  0xb1   :  { %1402 = vmatpush1.bf16.msra.mxu0 %v3898_v53  ;;  %1614 = vmatpush1.bf16.msra.mxu1 %v3901_v54  ;;  %v3976_v53 = vld [vmem:[#allocation5 + $0x4c0] ss:$16 sps:$4 sm:$0xff]   ;;  %v3979_v54 = vld [vmem:[#allocation5 + $0x4c8] ss:$16 sps:$4 sm:$0xff]  }
  0xb2   :  { %1403 = vmatprep.subr.bf16.mxu0 %v3906_v55  ;;  %1615 = vmatprep.subr.bf16.mxu1 %v3909_v56  ;;  %v3984_v55 = vld [vmem:[#allocation5 + $0x4e4] ss:$16 sps:$4 sm:$0xff]   ;;  %v3987_v56 = vld [vmem:[#allocation5 + $0x4ec] ss:$16 sps:$4 sm:$0xff]  }
  0xb5   :  { %1404 = vmatpush1.bf16.msra.mxu0 %v3904_v57  ;;  %1616 = vmatpush1.bf16.msra.mxu1 %v3907_v58  ;;  %v3982_v57 = vld [vmem:[#allocation5 + $0x4e0] ss:$16 sps:$4 sm:$0xff]   ;;  %v3985_v58 = vld [vmem:[#allocation5 + $0x4e8] ss:$16 sps:$4 sm:$0xff]  }
  0xb6   :  { %1405 = vmatprep.subr.bf16.mxu0 %v3912_v59  ;;  %1617 = vmatprep.subr.bf16.mxu1 %v3915_v60  ;;  %v3990_v59 = vld [vmem:[#allocation5 + $0x504] ss:$16 sps:$4 sm:$0xff]   ;;  %v3993_v60 = vld [vmem:[#allocation5 + $0x50c] ss:$16 sps:$4 sm:$0xff]  }
  0xb9   :  { %1406 = vmatpush1.bf16.msra.mxu0 %v3910_v61  ;;  %1618 = vmatpush1.bf16.msra.mxu1 %v3913_v62  ;;  %v3988_v61 = vld [vmem:[#allocation5 + $0x500] ss:$16 sps:$4 sm:$0xff]   ;;  %v3991_v62 = vld [vmem:[#allocation5 + $0x508] ss:$16 sps:$4 sm:$0xff]  }
  0xba   :  { %1407 = vmatprep.subr.bf16.mxu0 %v3918_v63  ;;  %1619 = vmatprep.subr.bf16.mxu1 %v3921_v0  ;;  %v3996_v63 = vld [vmem:[#allocation5 + $0x524] ss:$16 sps:$4 sm:$0xff]   ;;  %v3999_v0 = vld [vmem:[#allocation5 + $0x52c] ss:$16 sps:$4 sm:$0xff]  }
  0xbd   :  { %1408 = vmatpush1.bf16.msra.mxu0 %v3916_v1  ;;  %1620 = vmatpush1.bf16.msra.mxu1 %v3919_v2  ;;  %v3994_v1 = vld [vmem:[#allocation5 + $0x520] ss:$16 sps:$4 sm:$0xff]   ;;  %v3997_v2 = vld [vmem:[#allocation5 + $0x528] ss:$16 sps:$4 sm:$0xff]  }
  0xbe   :  { %1409 = vmatprep.subr.bf16.mxu0 %v3924_v3  ;;  %1621 = vmatprep.subr.bf16.mxu1 %v3927_v4  ;;  %v4002_v3 = vld [vmem:[#allocation5 + $0x544] ss:$16 sps:$4 sm:$0xff]   ;;  %v4005_v4 = vld [vmem:[#allocation5 + $0x54c] ss:$16 sps:$4 sm:$0xff]  }
  0xc1   :  { %1410 = vmatpush1.bf16.msra.mxu0 %v3922_v5  ;;  %1622 = vmatpush1.bf16.msra.mxu1 %v3925_v6  ;;  %v4000_v5 = vld [vmem:[#allocation5 + $0x540] ss:$16 sps:$4 sm:$0xff]   ;;  %v4003_v6 = vld [vmem:[#allocation5 + $0x548] ss:$16 sps:$4 sm:$0xff]  }
  0xc2   :  { %1411 = vmatprep.subr.bf16.mxu0 %v3930_v7  ;;  %1623 = vmatprep.subr.bf16.mxu1 %v3933_v8  ;;  %v4008_v7 = vld [vmem:[#allocation5 + $0x564] ss:$16 sps:$4 sm:$0xff]   ;;  %v4011_v8 = vld [vmem:[#allocation5 + $0x56c] ss:$16 sps:$4 sm:$0xff]  }
  0xc5   :  { %1412 = vmatpush1.bf16.msra.mxu0 %v3928_v9  ;;  %1624 = vmatpush1.bf16.msra.mxu1 %v3931_v10  ;;  %v4006_v9 = vld [vmem:[#allocation5 + $0x560] ss:$16 sps:$4 sm:$0xff]   ;;  %v4009_v10 = vld [vmem:[#allocation5 + $0x568] ss:$16 sps:$4 sm:$0xff]  }
  0xc6   :  { %1413 = vmatprep.subr.bf16.mxu0 %v3936_v11  ;;  %1625 = vmatprep.subr.bf16.mxu1 %v3939_v12  ;;  %v4014_v11 = vld [vmem:[#allocation5 + $0x584] ss:$16 sps:$4 sm:$0xff]   ;;  %v4017_v12 = vld [vmem:[#allocation5 + $0x58c] ss:$16 sps:$4 sm:$0xff]  }
  0xc9   :  { %1414 = vmatpush1.bf16.msra.mxu0 %v3934_v13  ;;  %1626 = vmatpush1.bf16.msra.mxu1 %v3937_v14  ;;  %v4012_v13 = vld [vmem:[#allocation5 + $0x580] ss:$16 sps:$4 sm:$0xff]   ;;  %v4015_v14 = vld [vmem:[#allocation5 + $0x588] ss:$16 sps:$4 sm:$0xff]  }
  0xca   :  { %1436 = vmatprep.subr.bf16.mxu0 %v3942_v15  ;;  %1648 = vmatprep.subr.bf16.mxu1 %v3945_v18  ;;  %v4020_v15 = vld [vmem:[#allocation5 + $0x5a4] ss:$16 sps:$4 sm:$0xff]   ;;  %v4021_v18 = vld [vmem:[#allocation5 + $0x5a8] ss:$16 sps:$4 sm:$0xff]  }
  0xcc   :  { %1416 = vmatmul.mubr.bf16.vlgmr.msra.gmra.mrb[0].mxu0 %v113_v21  ;;  %1628 = vmatmul.mubr.bf16.vlgmr.msra.gmra.mrb[0].mxu1 %v113_v21  ;;  %v4024_v21 = vld [vmem:[#allocation5 + $0x5c0] ss:$16 sps:$4 sm:$0xff]  }
  0xcd   :  { %1437 = vmatpush1.bf16.msra.mxu0 %v3940_v19  ;;  %1649 = vmatpush1.bf16.msra.mxu1 %v3943_v20  ;;  %v4026_v19 = vld [vmem:[#allocation5 + $0x5c4] ss:$16 sps:$4 sm:$0xff]   ;;  %v4029_v20 = vld [vmem:[#allocation5 + $0x5cc] ss:$16 sps:$4 sm:$0xff]  }
  0xce   :  { %1438 = vmatprep.subr.bf16.mxu0 %v3948_v24  ;;  %1650 = vmatprep.subr.bf16.mxu1 %v3951_v25  ;;  %v4035_v24 = vld [vmem:[#allocation5 + $0x5ec] ss:$16 sps:$4 sm:$0xff]   ;;  %v4030_v25 = vld [vmem:[#allocation5 + $0x5e0] ss:$16 sps:$4 sm:$0xff]  }
  0xcf   :  { %1425 = vmatprep.mubr.bf16.mxu0 %v121_v27  ;;  %1637 = vmatprep.mubr.bf16.mxu1 %v121_v27  ;;  %v87_v27 = vld [vmem:[#allocation2 + $0x20] sm:$0xff] }
  0xd1   :  { %1439 = vmatpush1.bf16.msra.mxu0 %v3946_v26  ;;  %1651 = vmatpush1.bf16.msra.mxu1 %v3949_v28  ;;  %v4033_v26 = vld [vmem:[#allocation5 + $0x5e8] ss:$16 sps:$4 sm:$0xff]  }
  0xd2   :  { %1440 = vmatprep.subr.bf16.mxu0 %v3954_v31  ;;  %1652 = vmatprep.subr.bf16.mxu1 %v3957_v32  ;;  %v94_v28 = vld [vmem:[#allocation2 + $0x58] sm:$0xff]  ;;  %v109_v31 = vld [vmem:[#allocation2 + $0xd0] sm:$0xff] }
  0xd3   :  { %v4041_v32 = vld [vmem:[#allocation5 + $0x60c] ss:$16 sps:$4 sm:$0xff]   ;;  %v115_v34 = vpack.c.bf16 %v94_v28, %v87_v27  ;;  %v4110_v27 = vld [vmem:[#allocation7 + $0x164] ss:$16 sps:$4 sm:$0xff]  }
  0xd4   :  { %1426 = vmatmul.mubr.bf16.gmra.mrb[4].mxu0 %v120_v33  ;;  %1638 = vmatmul.mubr.bf16.gmra.mrb[4].mxu1 %v120_v33  ;;  %v4036_v33 = vld [vmem:[#allocation5 + $0x600] ss:$16 sps:$4 sm:$0xff]   ;;  %v4113_v28 = vld [vmem:[#allocation7 + $0x16c] ss:$16 sps:$4 sm:$0xff]  }
  0xd5   :  { %1441 = vmatpush1.bf16.msra.mxu0 %v3952_v36  ;;  %1653 = vmatpush1.bf16.msra.mxu1 %v3955_v37  ;;  %v123_v36 = vpack.c.bf16 %v109_v31, %v102_v30  ;;  %v4044_v37 = vld [vmem:[#allocation7 + $0x4] ss:$16 sps:$4 sm:$0xff]   ;;  %v4111_v30 = vld [vmem:[#allocation7 + $0x168] ss:$16 sps:$4 sm:$0xff]  }
  0xd6   :  { %1442 = vmatprep.subr.bf16.mxu0 %v3960_v38  ;;  %1654 = vmatprep.subr.bf16.mxu1 %v3963_v39  ;;  %v4047_v38 = vld [vmem:[#allocation7 + $0xc] ss:$16 sps:$4 sm:$0xff]   ;;  %v101_v39 = vld [vmem:[#allocation2 + $0x90] sm:$0xff] }
  0xd7   :  { %1468 = vmatprep.mubr.bf16.mxu0 %v116_v40  ;;  %1680 = vmatprep.mubr.bf16.mxu1 %v116_v40  ;;  %v108_v40 = vld [vmem:[#allocation2 + $0xc8] sm:$0xff]  ;;  %v4116_v31 = vld [vmem:[#allocation7 + $0x184] ss:$16 sps:$4 sm:$0xff]  }
  0xd9   :  { %1443 = vmatpush1.bf16.msra.mxu0 %v3958_v41  ;;  %1655 = vmatpush1.bf16.msra.mxu1 %v3961_v42  ;;  %v122_v41 = vpack.c.bf16 %v108_v40, %v101_v39  ;;  %v89_v42 = vld [vmem:[#allocation2 + $0x30] sm:$0xff]  ;;  %v4131_v40 = vld [vmem:[#allocation7 + $0x1cc] ss:$16 sps:$4 sm:$0xff]  }
  0xda   :  { %1444 = vmatprep.subr.bf16.mxu0 %v3966_v43  ;;  %1656 = vmatprep.subr.bf16.mxu1 %v3969_v44  ;;  %v96_v43 = vld [vmem:[#allocation2 + $0x68] sm:$0xff]  ;;  %v4394_v44 = vmov 0   ;;  %v4128_v39 = vld [vmem:[#allocation7 + $0x1c4] ss:$16 sps:$4 sm:$0xff]  }
  0xdd   :  { %1445 = vmatpush1.bf16.msra.mxu0 %v3964_v45  ;;  %1657 = vmatpush1.bf16.msra.mxu1 %v3967_v46  ;;  %v117_v45 = vpack.c.bf16 %v96_v43, %v89_v42  ;;  %v4042_v46 = vld [vmem:[#allocation7] ss:$16 sps:$4 sm:$0xff]   ;;  %v4129_v42 = vld [vmem:[#allocation7 + $0x1c8] ss:$16 sps:$4 sm:$0xff]   ;;  %v4134_v43 = vld [vmem:[#allocation7 + $0x1e4] ss:$16 sps:$4 sm:$0xff]  }
  0xde   :  { %1446 = vmatprep.subr.bf16.mxu0 %v3972_v47  ;;  %1658 = vmatprep.subr.bf16.mxu1 %v3975_v48  ;;  %v4045_v47 = vld [vmem:[#allocation7 + $0x8] ss:$16 sps:$4 sm:$0xff]   ;;  %v4050_v48 = vld [vmem:[#allocation7 + $0x24] ss:$16 sps:$4 sm:$0xff]  }
  0xe1   :  { %1447 = vmatpush1.bf16.msra.mxu0 %v3970_v49  ;;  %1659 = vmatpush1.bf16.msra.mxu1 %v3973_v50  ;;  %v4053_v49 = vld [vmem:[#allocation7 + $0x2c] ss:$16 sps:$4 sm:$0xff]   ;;  %v103_v50 = vld [vmem:[#allocation2 + $0xa0] sm:$0xff] }
  0xe2   :  { %1448 = vmatprep.subr.bf16.mxu0 %v3978_v51  ;;  %1660 = vmatprep.subr.bf16.mxu1 %v3981_v52  ;;  %v110_v51 = vld [vmem:[#allocation2 + $0xd8] sm:$0xff]  ;;  %v4048_v52 = vld [vmem:[#allocation7 + $0x20] ss:$16 sps:$4 sm:$0xff]  }
  0xe5   :  { %1449 = vmatpush1.bf16.msra.mxu0 %v3976_v53  ;;  %1661 = vmatpush1.bf16.msra.mxu1 %v3979_v54  ;;  %v4051_v53 = vld [vmem:[#allocation7 + $0x28] ss:$16 sps:$4 sm:$0xff]   ;;  %v4056_v54 = vld [vmem:[#allocation7 + $0x44] ss:$16 sps:$4 sm:$0xff]  }
  0xe6   :  { %1450 = vmatprep.subr.bf16.mxu0 %v3984_v55  ;;  %1662 = vmatprep.subr.bf16.mxu1 %v3987_v56  ;;  %v4059_v55 = vld [vmem:[#allocation7 + $0x4c] ss:$16 sps:$4 sm:$0xff]   ;;  %v124_v56 = vpack.c.bf16 %v110_v51, %v103_v50 }
  0xe9   :  { %1451 = vmatpush1.bf16.msra.mxu0 %v3982_v57  ;;  %1663 = vmatpush1.bf16.msra.mxu1 %v3985_v58  ;;  %v4054_v57 = vld [vmem:[#allocation7 + $0x40] ss:$16 sps:$4 sm:$0xff]   ;;  %v4057_v58 = vld [vmem:[#allocation7 + $0x48] ss:$16 sps:$4 sm:$0xff]  }
  0xea   :  { %1452 = vmatprep.subr.bf16.mxu0 %v3990_v59  ;;  %1664 = vmatprep.subr.bf16.mxu1 %v3993_v60  ;;  %v4062_v59 = vld [vmem:[#allocation7 + $0x64] ss:$16 sps:$4 sm:$0xff]   ;;  %v4065_v60 = vld [vmem:[#allocation7 + $0x6c] ss:$16 sps:$4 sm:$0xff]  }
  0xed   :  { %1453 = vmatpush1.bf16.msra.mxu0 %v3988_v61  ;;  %1665 = vmatpush1.bf16.msra.mxu1 %v3991_v62  ;;  %v4060_v61 = vld [vmem:[#allocation7 + $0x60] ss:$16 sps:$4 sm:$0xff]   ;;  %v4063_v62 = vld [vmem:[#allocation7 + $0x68] ss:$16 sps:$4 sm:$0xff]  }
  0xee   :  { %1454 = vmatprep.subr.bf16.mxu0 %v3996_v63  ;;  %1666 = vmatprep.subr.bf16.mxu1 %v3999_v0  ;;  %v4068_v63 = vld [vmem:[#allocation7 + $0x84] ss:$16 sps:$4 sm:$0xff]   ;;  %v4071_v0 = vld [vmem:[#allocation7 + $0x8c] ss:$16 sps:$4 sm:$0xff]  }
  0xf1   :  { %1455 = vmatpush1.bf16.msra.mxu0 %v3994_v1  ;;  %1667 = vmatpush1.bf16.msra.mxu1 %v3997_v2  ;;  %v4066_v1 = vld [vmem:[#allocation7 + $0x80] ss:$16 sps:$4 sm:$0xff]   ;;  %v4069_v2 = vld [vmem:[#allocation7 + $0x88] ss:$16 sps:$4 sm:$0xff]  }
  0xf2   :  { %1456 = vmatprep.subr.bf16.mxu0 %v4002_v3  ;;  %1668 = vmatprep.subr.bf16.mxu1 %v4005_v4  ;;  %v4074_v3 = vld [vmem:[#allocation7 + $0xa4] ss:$16 sps:$4 sm:$0xff]   ;;  %v4077_v4 = vld [vmem:[#allocation7 + $0xac] ss:$16 sps:$4 sm:$0xff]  }
  0xf5   :  { %1457 = vmatpush1.bf16.msra.mxu0 %v4000_v5  ;;  %1669 = vmatpush1.bf16.msra.mxu1 %v4003_v6  ;;  %v4072_v5 = vld [vmem:[#allocation7 + $0xa0] ss:$16 sps:$4 sm:$0xff]   ;;  %v4075_v6 = vld [vmem:[#allocation7 + $0xa8] ss:$16 sps:$4 sm:$0xff]  }
  0xf6   :  { %1458 = vmatprep.subr.bf16.mxu0 %v4008_v7  ;;  %1670 = vmatprep.subr.bf16.mxu1 %v4011_v8  ;;  %v4080_v7 = vld [vmem:[#allocation7 + $0xc4] ss:$16 sps:$4 sm:$0xff]   ;;  %v4083_v8 = vld [vmem:[#allocation7 + $0xcc] ss:$16 sps:$4 sm:$0xff]  }
  0xf9   :  { %1459 = vmatpush1.bf16.msra.mxu0 %v4006_v9  ;;  %1671 = vmatpush1.bf16.msra.mxu1 %v4009_v10  ;;  %v4078_v9 = vld [vmem:[#allocation7 + $0xc0] ss:$16 sps:$4 sm:$0xff]   ;;  %v4081_v10 = vld [vmem:[#allocation7 + $0xc8] ss:$16 sps:$4 sm:$0xff]  }
  0xfa   :  { %1460 = vmatprep.subr.bf16.mxu0 %v4014_v11  ;;  %1672 = vmatprep.subr.bf16.mxu1 %v4017_v12  ;;  %v4086_v11 = vld [vmem:[#allocation7 + $0xe4] ss:$16 sps:$4 sm:$0xff]   ;;  %v4089_v12 = vld [vmem:[#allocation7 + $0xec] ss:$16 sps:$4 sm:$0xff]  }
  0xfd   :  { %1461 = vmatpush1.bf16.msra.mxu0 %v4012_v13  ;;  %1673 = vmatpush1.bf16.msra.mxu1 %v4015_v14  ;;  %v4084_v13 = vld [vmem:[#allocation7 + $0xe0] ss:$16 sps:$4 sm:$0xff]   ;;  %v4087_v14 = vld [vmem:[#allocation7 + $0xe8] ss:$16 sps:$4 sm:$0xff]  }
  0xfe   :  { %1462 = vmatprep.subr.bf16.mxu0 %v4020_v15  ;;  %1674 = vmatprep.subr.bf16.mxu1 %v4023_v16  ;;  %v4092_v15 = vld [vmem:[#allocation7 + $0x104] ss:$16 sps:$4 sm:$0xff]   ;;  %v4095_v16 = vld [vmem:[#allocation7 + $0x10c] ss:$16 sps:$4 sm:$0xff]  }
 0x101   :  { %1463 = vmatpush1.bf16.msra.mxu0 %v4018_v17  ;;  %1675 = vmatpush1.bf16.msra.mxu1 %v4021_v18  ;;  %v4090_v17 = vld [vmem:[#allocation7 + $0x100] ss:$16 sps:$4 sm:$0xff]   ;;  %v4093_v18 = vld [vmem:[#allocation7 + $0x108] ss:$16 sps:$4 sm:$0xff]  }
 0x102   :  { %1464 = vmatprep.subr.bf16.mxu0 %v4026_v19  ;;  %1676 = vmatprep.subr.bf16.mxu1 %v4029_v20  ;;  %v4098_v19 = vld [vmem:[#allocation7 + $0x124] ss:$16 sps:$4 sm:$0xff]   ;;  %v4101_v20 = vld [vmem:[#allocation7 + $0x12c] ss:$16 sps:$4 sm:$0xff]  }
 0x105   :  { %1465 = vmatpush1.bf16.msra.mxu0 %v4024_v21  ;;  %1677 = vmatpush1.bf16.msra.mxu1 %v4027_v22  ;;  %v4096_v21 = vld [vmem:[#allocation7 + $0x120] ss:$16 sps:$4 sm:$0xff]   ;;  %v4099_v22 = vld [vmem:[#allocation7 + $0x128] ss:$16 sps:$4 sm:$0xff]  }
 0x106   :  { %1466 = vmatprep.subr.bf16.mxu0 %v4032_v23  ;;  %1678 = vmatprep.subr.bf16.mxu1 %v4035_v24  ;;  %v4104_v23 = vld [vmem:[#allocation7 + $0x144] ss:$16 sps:$4 sm:$0xff]   ;;  %v4107_v24 = vld [vmem:[#allocation7 + $0x14c] ss:$16 sps:$4 sm:$0xff]  }
 0x109   :  { %1467 = vmatpush1.bf16.msra.mxu0 %v4030_v25  ;;  %1679 = vmatpush1.bf16.msra.mxu1 %v4033_v26  ;;  %v4102_v25 = vld [vmem:[#allocation7 + $0x140] ss:$16 sps:$4 sm:$0xff]   ;;  %v4105_v26 = vld [vmem:[#allocation7 + $0x148] ss:$16 sps:$4 sm:$0xff]  }
 0x10a   :  { %1489 = vmatprep.subr.bf16.mxu0 %v4038_v29  ;;  %1701 = vmatprep.subr.bf16.mxu1 %v4041_v32  ;;  %v4108_v29 = vld [vmem:[#allocation7 + $0x160] ss:$16 sps:$4 sm:$0xff]   ;;  %v4119_v32 = vld [vmem:[#allocation7 + $0x18c] ss:$16 sps:$4 sm:$0xff]  }
 0x10c   :  { %1469 = vmatmul.mubr.bf16.vlgmr.msra.gmra.mrb[0].mxu0 %v115_v34  ;;  %1681 = vmatmul.mubr.bf16.vlgmr.msra.gmra.mrb[0].mxu1 %v115_v34  ;;  %v4117_v34 = vld [vmem:[#allocation7 + $0x188] ss:$16 sps:$4 sm:$0xff]  }
 0x10d   :  { %1490 = vmatpush1.bf16.msra.mxu0 %v4036_v33  ;;  %1478 = vmatprep.mubr.bf16.mxu0 %v123_v36  ;;  %v4114_v33 = vld [vmem:[#allocation7 + $0x180] ss:$16 sps:$4 sm:$0xff]  }
 0x10e   :  { %1690 = vmatprep.mubr.bf16.mxu1 %v123_v36  ;;  %1702 = vmatpush1.bf16.msra.mxu1 %v4039_v35  ;;  %v4122_v35 = vld [vmem:[#allocation7 + $0x1a4] ss:$16 sps:$4 sm:$0xff]   ;;  %v4125_v36 = vld [vmem:[#allocation7 + $0x1ac] ss:$16 sps:$4 sm:$0xff]  }
 0x10f   :  { %2568 = vmatprep.subr.bf16.mxu0 %v4044_v37  ;;  %2674 = vmatprep.subr.bf16.mxu1 %v4047_v38  ;;  %v4120_v37 = vld [vmem:[#allocation7 + $0x1a0] ss:$16 sps:$4 sm:$0xff]   ;;  %v4123_v38 = vld [vmem:[#allocation7 + $0x1a8] ss:$16 sps:$4 sm:$0xff]  }
 0x114   :  { %1479 = vmatmul.mubr.bf16.gmra.mrb[4].mxu0 %v122_v41  ;;  %1691 = vmatmul.mubr.bf16.gmra.mrb[4].mxu1 %v122_v41  ;;  %v4126_v41 = vld [vmem:[#allocation7 + $0x1c0] ss:$16 sps:$4 sm:$0xff]  }
 0x115   :  { %1521 = vmatprep.mubr.bf16.mxu0 %v4394_v44  ;;  %1733 = vmatprep.mubr.bf16.mxu1 %v4394_v44 }
 0x11c   :  { %3400 = vmatmul.mubr.msk.bf16.vlgmr.msra.gmra.mrb[0].mxu0 %vm1323_vm0, %v117_v45  ;;  %3402 = vmatmul.mubr.msk.bf16.vlgmr.msra.gmra.mrb[0].mxu1 %vm1323_vm0, %v117_v45  ;;  %v4132_v45 = vld [vmem:[#allocation7 + $0x1e0] ss:$16 sps:$4 sm:$0xff]  }
 0x11d   :  { %1531 = vmatprep.mubr.bf16.mxu0 %v4394_v44  ;;  %1743 = vmatprep.mubr.bf16.mxu1 %v4394_v44  ;;  %v4137_v44 = vld [vmem:[#allocation7 + $0x1ec] ss:$16 sps:$4 sm:$0xff]  }
 0x11e   :  { %2569 = vmatpush1.bf16.msra.mxu0 %v4042_v46  ;;  %2675 = vmatpush1.bf16.msra.mxu1 %v4045_v47  ;;  %v4135_v46 = vld [vmem:[#allocation7 + $0x1e8] ss:$16 sps:$4 sm:$0xff]   ;;  %v4140_v47 = vld [vmem:[#allocation7 + $0x204] ss:$16 sps:$4 sm:$0xff]  }
 0x11f   :  { %2570 = vmatprep.subr.bf16.mxu0 %v4050_v48  ;;  %2676 = vmatprep.subr.bf16.mxu1 %v4053_v49  ;;  %v4143_v48 = vld [vmem:[#allocation7 + $0x20c] ss:$16 sps:$4 sm:$0xff]   ;;  %v323_v49 = vlaneseq }
 0x121   :  { %v4504_v50 = vshrl.u32 %v323_v49, 7 }
 0x122   :  { %2571 = vmatpush1.bf16.msra.mxu0 %v4048_v52  ;;  %2677 = vmatpush1.bf16.msra.mxu1 %v4051_v53  ;;  %v321_v53 = vld [vmem:[%s4564_s2] sm:$0xf] }
 0x123   :  { %2572 = vmatprep.subr.bf16.mxu0 %v4056_v54  ;;  %2678 = vmatprep.subr.bf16.mxu1 %v4059_v55  ;;  %v325_v51 = vsub.s32 0, %v4504_v50  ;;  %v333_v52 = vsub.s32 2, %v4504_v50  ;;  %v329_v54 = vsub.s32 1, %v4504_v50  ;;  %v337_v55 = vsub.s32 3, %v4504_v50 }
 0x124   :  { %3401 = vmatmul.mubr.msk.bf16.gmra.mrb[4].mxu0 %vm1323_vm0, %v124_v56  ;;  %3403 = vmatmul.mubr.msk.bf16.gmra.mrb[4].mxu1 %vm1323_vm0, %v124_v56 }
 0x125   :  { %v326_v56 = vrot.slane %v321_v53, %v325_v51 }
 0x126   :  { %2573 = vmatpush1.bf16.msra.mxu0 %v4054_v57  ;;  %2679 = vmatpush1.bf16.msra.mxu1 %v4057_v58  ;;  %v334_v57 = vrot.slane %v321_v53, %v333_v52  ;;  %v330_v58 = vrot.slane %v321_v53, %v329_v54 }
 0x127   :  { %2574 = vmatprep.subr.bf16.mxu0 %v4062_v59  ;;  %2680 = vmatprep.subr.bf16.mxu1 %v4065_v60  ;;  %v338_v59 = vrot.slane %v321_v53, %v337_v55 }
 0x12a   :  { %2575 = vmatpush1.bf16.msra.mxu0 %v4060_v61  ;;  %2681 = vmatpush1.bf16.msra.mxu1 %v4063_v62 }
 0x12b   :  { %2576 = vmatprep.subr.bf16.mxu0 %v4068_v63  ;;  %2682 = vmatprep.subr.bf16.mxu1 %v4071_v0 }
 0x12e   :  { %2577 = vmatpush1.bf16.msra.mxu0 %v4066_v1  ;;  %2683 = vmatpush1.bf16.msra.mxu1 %v4069_v2 }
 0x12f   :  { %2578 = vmatprep.subr.bf16.mxu0 %v4074_v3  ;;  %2684 = vmatprep.subr.bf16.mxu1 %v4077_v4 }
 0x132   :  { %2579 = vmatpush1.bf16.msra.mxu0 %v4072_v5  ;;  %2685 = vmatpush1.bf16.msra.mxu1 %v4075_v6 }
 0x133   :  { %2580 = vmatprep.subr.bf16.mxu0 %v4080_v7  ;;  %2686 = vmatprep.subr.bf16.mxu1 %v4083_v8 }
 0x136   :  { %2581 = vmatpush1.bf16.msra.mxu0 %v4078_v9  ;;  %2687 = vmatpush1.bf16.msra.mxu1 %v4081_v10 }
 0x137   :  { %2582 = vmatprep.subr.bf16.mxu0 %v4086_v11  ;;  %2688 = vmatprep.subr.bf16.mxu1 %v4089_v12 }
 0x13a   :  { %2583 = vmatpush1.bf16.msra.mxu0 %v4084_v13  ;;  %2689 = vmatpush1.bf16.msra.mxu1 %v4087_v14 }
 0x13b   :  { %2584 = vmatprep.subr.bf16.mxu0 %v4092_v15  ;;  %2690 = vmatprep.subr.bf16.mxu1 %v4095_v16 }
 0x13e   :  { %2585 = vmatpush1.bf16.msra.mxu0 %v4090_v17  ;;  %2691 = vmatpush1.bf16.msra.mxu1 %v4093_v18 }
 0x13f   :  { %2586 = vmatprep.subr.bf16.mxu0 %v4098_v19  ;;  %2692 = vmatprep.subr.bf16.mxu1 %v4101_v20 }
 0x142   :  { %2587 = vmatpush1.bf16.msra.mxu0 %v4096_v21  ;;  %2693 = vmatpush1.bf16.msra.mxu1 %v4099_v22 }
 0x143   :  { %2588 = vmatprep.subr.bf16.mxu0 %v4104_v23  ;;  %2694 = vmatprep.subr.bf16.mxu1 %v4107_v24 }
 0x146   :  { %2589 = vmatpush1.bf16.msra.mxu0 %v4102_v25  ;;  %2695 = vmatpush1.bf16.msra.mxu1 %v4105_v26  ;;  %v4138_v26 = vld [vmem:[#allocation7 + $0x200] ss:$16 sps:$4 sm:$0xff]  }
 0x147   :  { %2590 = vmatprep.subr.bf16.mxu0 %v4110_v27  ;;  %2696 = vmatprep.subr.bf16.mxu1 %v4113_v28  ;;  %v4141_v27 = vld [vmem:[#allocation7 + $0x208] ss:$16 sps:$4 sm:$0xff]  }
 0x14a   :  { %2591 = vmatpush1.bf16.msra.mxu0 %v4108_v29  ;;  %2697 = vmatpush1.bf16.msra.mxu1 %v4111_v30 }
 0x14b   :  { %2592 = vmatprep.subr.bf16.mxu0 %v4116_v31  ;;  %2698 = vmatprep.subr.bf16.mxu1 %v4119_v32  ;;  %v4146_v32 = vld [vmem:[#allocation7 + $0x224] ss:$16 sps:$4 sm:$0xff]  }
 0x14e   :  { %2593 = vmatpush1.bf16.msra.mxu0 %v4114_v33  ;;  %2699 = vmatpush1.bf16.msra.mxu1 %v4117_v34  ;;  %v4149_v33 = vld [vmem:[#allocation7 + $0x22c] ss:$16 sps:$4 sm:$0xff]  }
 0x14f   :  { %2594 = vmatprep.subr.bf16.mxu0 %v4122_v35  ;;  %2700 = vmatprep.subr.bf16.mxu1 %v4125_v36 }
 0x152   :  { %2595 = vmatpush1.bf16.msra.mxu0 %v4120_v37  ;;  %2701 = vmatpush1.bf16.msra.mxu1 %v4123_v38 }
 0x153   :  { %2596 = vmatprep.subr.bf16.mxu0 %v4128_v39  ;;  %2702 = vmatprep.subr.bf16.mxu1 %v4131_v40 }
 0x156   :  { %2597 = vmatpush1.bf16.msra.mxu0 %v4126_v41  ;;  %2703 = vmatpush1.bf16.msra.mxu1 %v4129_v42 }
 0x157   :  { %2598 = vmatprep.subr.bf16.mxu0 %v4134_v43  ;;  %2704 = vmatprep.subr.bf16.mxu1 %v4137_v44  ;;  %v4144_v44 = vld [vmem:[#allocation7 + $0x220] ss:$16 sps:$4 sm:$0xff]  }
 0x15a   :  { %2599 = vmatpush1.bf16.msra.mxu0 %v4132_v45  ;;  %2705 = vmatpush1.bf16.msra.mxu1 %v4135_v46  ;;  %v4147_v45 = vld [vmem:[#allocation7 + $0x228] ss:$16 sps:$4 sm:$0xff]   ;;  %v4152_v46 = vld [vmem:[#allocation7 + $0x244] ss:$16 sps:$4 sm:$0xff]  }
 0x15b   :  { %2621 = vmatprep.subr.bf16.mxu0 %v4140_v47  ;;  %2727 = vmatprep.subr.bf16.mxu1 %v4143_v48 }
 0x1ef   :  { %v1523_v60 = vpop.f32.mrb[0].mxu0  ;;  %v1735_v61 = vpop.f32.mrb[0].mxu1 }
 0x1f0   :  { %v3640_v62 = vadd.f32 %v1523_v60, %v326_v56  ;;  %v3648_v63 = vadd.f32 %v1735_v61, %v334_v57  ;;  %v1525_v0 = vpop.f32.mrb[1].mxu0  ;;  %v1737_v1 = vpop.f32.mrb[1].mxu1  ;;  %v4155_v60 = vld [vmem:[#allocation7 + $0x24c] ss:$16 sps:$4 sm:$0xff]  }
 0x1f1   :  { %v3641_v2 = vadd.f32 %v1525_v0, %v330_v58  ;;  %v3649_v3 = vadd.f32 %v1737_v1, %v338_v59  ;;  %v1527_v4 = vpop.f32.mrb[2].mxu0  ;;  %v1739_v5 = vpop.f32.mrb[2].mxu1  ;;  %v4150_v1 = vld [vmem:[#allocation7 + $0x240] ss:$16 sps:$4 sm:$0xff]  }
 0x1f2   :  { %v3642_v6 = vadd.f32 %v1527_v4, %v326_v56  ;;  %v3650_v7 = vadd.f32 %v1739_v5, %v334_v57  ;;  %v1529_v8 = vpop.f32.mrb[3].mxu0  ;;  %v1741_v9 = vpop.f32.mrb[3].mxu1  ;;  %v1754_v12 = vmax.f32 %v3640_v62, 0.0  ;;  %v1756_v13 = vmax.f32 %v3648_v63, 0.0  ;;  %v4161_v4 = vld [vmem:[#allocation7 + $0x26c] ss:$16 sps:$4 sm:$0xff]  }
 0x1f3   :  { %v3643_v10 = vadd.f32 %v1529_v8, %v330_v58  ;;  %v3651_v11 = vadd.f32 %v1741_v9, %v338_v59  ;;  %v1755_v16 = vmax.f32 %v3641_v2, 0.0  ;;  %v1757_v17 = vmax.f32 %v3649_v3, 0.0  ;;  %v4153_v2 = vld [vmem:[#allocation7 + $0x248] ss:$16 sps:$4 sm:$0xff]   ;;  %v4158_v3 = vld [vmem:[#allocation7 + $0x264] ss:$16 sps:$4 sm:$0xff]  }
 0x1f4   :  { %v1758_v14 = vmax.f32 %v3642_v6, 0.0  ;;  %v1760_v15 = vmax.f32 %v3650_v7, 0.0  ;;  %v4156_v5 = vld [vmem:[#allocation7 + $0x260] ss:$16 sps:$4 sm:$0xff]   ;;  %v4159_v6 = vld [vmem:[#allocation7 + $0x268] ss:$16 sps:$4 sm:$0xff]  }
 0x1f5   :  { %v1759_v18 = vmax.f32 %v3643_v10, 0.0  ;;  %v1761_v19 = vmax.f32 %v3651_v11, 0.0  ;;  %v4164_v7 = vld [vmem:[#allocation7 + $0x284] ss:$16 sps:$4 sm:$0xff]   ;;  %v4167_v8 = vld [vmem:[#allocation7 + $0x28c] ss:$16 sps:$4 sm:$0xff]  }
 0x1f6   :  { %v1770_v20 = vpack.c.bf16 %v1758_v14, %v1754_v12  ;;  %v4521_v21 = vpack.c.bf16 %v1760_v15, %v1756_v13  ;;  %v4162_v9 = vld [vmem:[#allocation7 + $0x280] ss:$16 sps:$4 sm:$0xff]   ;;  %v4165_v10 = vld [vmem:[#allocation7 + $0x288] ss:$16 sps:$4 sm:$0xff]   ;;  %v4170_v11 = vld [vmem:[#allocation7 + $0x2a4] ss:$16 sps:$4 sm:$0xff]  }
 0x1f7   :  { %v1771_v22 = vpack.c.bf16 %v1759_v18, %v1755_v16  ;;  %v1773_v23 = vpack.c.bf16 %v1761_v19, %v1757_v17  ;;  %v1533_v24 = vpop.f32.mrb[4].mxu0  ;;  %v1745_v25 = vpop.f32.mrb[4].mxu1  ;;  %v4173_v12 = vld [vmem:[#allocation7 + $0x2ac] ss:$16 sps:$4 sm:$0xff]   ;;  %v4168_v13 = vld [vmem:[#allocation7 + $0x2a0] ss:$16 sps:$4 sm:$0xff]  }
 0x1f8   :  { %v3644_v28 = vadd.f32 %v1533_v24, %v326_v56  ;;  %v3652_v29 = vadd.f32 %v1745_v25, %v334_v57  ;;  %v1535_v30 = vpop.f32.mrb[5].mxu0  ;;  %v1747_v31 = vpop.f32.mrb[5].mxu1  ;;  %v4171_v14 = vld [vmem:[#allocation7 + $0x2a8] ss:$16 sps:$4 sm:$0xff]   ;;  %v4176_v15 = vld [vmem:[#allocation7 + $0x2c4] ss:$16 sps:$4 sm:$0xff]  }
 0x1f9   :  { %v3645_v34 = vadd.f32 %v1535_v30, %v330_v58  ;;  %v3653_v35 = vadd.f32 %v1747_v31, %v338_v59  ;;  %v1537_v36 = vpop.f32.mrb[6].mxu0  ;;  %v1749_v37 = vpop.f32.mrb[6].mxu1  ;;  %2600 = vmatprep.mubr.bf16.mxu0 %v1771_v22  ;;  %2706 = vmatprep.mubr.bf16.mxu1 %v1771_v22  ;;  %v4179_v16 = vld [vmem:[#allocation7 + $0x2cc] ss:$16 sps:$4 sm:$0xff]   ;;  %v4174_v17 = vld [vmem:[#allocation7 + $0x2c0] ss:$16 sps:$4 sm:$0xff]  }
 0x1fa   :  { %v3646_v38 = vadd.f32 %v1537_v36, %v326_v56  ;;  %v3654_v39 = vadd.f32 %v1749_v37, %v334_v57  ;;  %v1539_v40 = vpop.f32.mrb[7].mxu0  ;;  %v1751_v41 = vpop.f32.mrb[7].mxu1  ;;  %2601 = vmatmul.mubr.bf16.vlgmr.msra.gmra.mrb[8].mxu0 %v1770_v20  ;;  %2707 = vmatmul.mubr.bf16.vlgmr.msra.gmra.mrb[8].mxu1 %v1770_v20  ;;  %v1762_v47 = vmax.f32 %v3644_v28, 0.0  ;;  %v1764_v48 = vmax.f32 %v3652_v29, 0.0  ;;  %v4177_v18 = vld [vmem:[#allocation7 + $0x2c8] ss:$16 sps:$4 sm:$0xff]  }
 0x1fb   :  { %v3647_v42 = vadd.f32 %v1539_v40, %v330_v58  ;;  %v3655_v43 = vadd.f32 %v1751_v41, %v338_v59  ;;  %2622 = vmatpush1.bf16.msra.mxu0 %v4138_v26  ;;  %2728 = vmatpush1.bf16.msra.mxu1 %v4141_v27  ;;  %v1763_v56 = vmax.f32 %v3645_v34, 0.0  ;;  %v1765_v57 = vmax.f32 %v3653_v35, 0.0  ;;  %v4182_v19 = vld [vmem:[#allocation7 + $0x2e4] ss:$16 sps:$4 sm:$0xff]   ;;  %v4185_v20 = vld [vmem:[#allocation7 + $0x2ec] ss:$16 sps:$4 sm:$0xff]  }
 0x1fc   :  { %v1766_v49 = vmax.f32 %v3646_v38, 0.0  ;;  %v1768_v53 = vmax.f32 %v3654_v39, 0.0  ;;  %2623 = vmatprep.subr.bf16.mxu0 %v4146_v32  ;;  %2729 = vmatprep.subr.bf16.mxu1 %v4149_v33  ;;  %v4180_v22 = vld [vmem:[#allocation7 + $0x2e0] ss:$16 sps:$4 sm:$0xff]   ;;  %v4188_v24 = vld [vmem:[#allocation7 + $0x304] ss:$16 sps:$4 sm:$0xff]  }
 0x1fd   :  { %v1767_v61 = vmax.f32 %v3647_v42, 0.0  ;;  %v1769_v62 = vmax.f32 %v3655_v43, 0.0  ;;  %v4191_v25 = vld [vmem:[#allocation7 + $0x30c] ss:$16 sps:$4 sm:$0xff]   ;;  %v4186_v26 = vld [vmem:[#allocation7 + $0x300] ss:$16 sps:$4 sm:$0xff]  }
 0x1fe   :  { %v1774_v63 = vpack.c.bf16 %v1766_v49, %v1762_v47  ;;  %v4523_v0 = vpack.c.bf16 %v1768_v53, %v1764_v48  ;;  %v4189_v27 = vld [vmem:[#allocation7 + $0x308] ss:$16 sps:$4 sm:$0xff]   ;;  %v4194_v28 = vld [vmem:[#allocation7 + $0x324] ss:$16 sps:$4 sm:$0xff]   ;;  %v4197_v29 = vld [vmem:[#allocation7 + $0x32c] ss:$16 sps:$4 sm:$0xff]  }
 0x1ff   :  { %v1775_v58 = vpack.c.bf16 %v1767_v61, %v1763_v56  ;;  %v4525_v59 = vpack.c.bf16 %v1769_v62, %v1765_v57  ;;  %2624 = vmatpush1.bf16.msra.mxu0 %v4144_v44  ;;  %2730 = vmatpush1.bf16.msra.mxu1 %v4147_v45  ;;  %v4192_v30 = vld [vmem:[#allocation7 + $0x320] ss:$16 sps:$4 sm:$0xff]   ;;  %v4195_v31 = vld [vmem:[#allocation7 + $0x328] ss:$16 sps:$4 sm:$0xff]   ;;  %v4200_v32 = vld [vmem:[#allocation7 + $0x344] ss:$16 sps:$4 sm:$0xff]  }
 0x200   :  { %2625 = vmatprep.subr.bf16.mxu0 %v4152_v46  ;;  %2731 = vmatprep.subr.bf16.mxu1 %v4155_v60  ;;  %v4203_v33 = vld [vmem:[#allocation7 + $0x34c] ss:$16 sps:$4 sm:$0xff]   ;;  %v4198_v34 = vld [vmem:[#allocation7 + $0x340] ss:$16 sps:$4 sm:$0xff]   ;;  %v4201_v35 = vld [vmem:[#allocation7 + $0x348] ss:$16 sps:$4 sm:$0xff]  }
 0x201   :  { %2610 = vmatprep.mubr.bf16.mxu0 %v1775_v58  ;;  %2716 = vmatprep.mubr.bf16.mxu1 %v1775_v58  ;;  %v4206_v36 = vld [vmem:[#allocation7 + $0x364] ss:$16 sps:$4 sm:$0xff]   ;;  %v4209_v37 = vld [vmem:[#allocation7 + $0x36c] ss:$16 sps:$4 sm:$0xff]   ;;  %v4204_v38 = vld [vmem:[#allocation7 + $0x360] ss:$16 sps:$4 sm:$0xff]  }
 0x202   :  { %2611 = vmatmul.mubr.bf16.gmra.mrb[12].mxu0 %v1774_v63  ;;  %2717 = vmatmul.mubr.bf16.gmra.mrb[12].mxu1 %v1774_v63  ;;  %v4207_v39 = vld [vmem:[#allocation7 + $0x368] ss:$16 sps:$4 sm:$0xff]   ;;  %v4212_v40 = vld [vmem:[#allocation7 + $0x384] ss:$16 sps:$4 sm:$0xff]   ;;  %v4215_v41 = vld [vmem:[#allocation7 + $0x38c] ss:$16 sps:$4 sm:$0xff]  }
 0x203   :  { %2626 = vmatpush1.bf16.msra.mxu0 %v4150_v1  ;;  %2732 = vmatpush1.bf16.msra.mxu1 %v4153_v2  ;;  %v4210_v42 = vld [vmem:[#allocation7 + $0x380] ss:$16 sps:$4 sm:$0xff]   ;;  %v4213_v43 = vld [vmem:[#allocation7 + $0x388] ss:$16 sps:$4 sm:$0xff]   ;;  %v4218_v44 = vld [vmem:[#allocation7 + $0x3a4] ss:$16 sps:$4 sm:$0xff]  }
 0x204   :  { %2653 = vmatprep.mubr.bf16.mxu0 %v1773_v23  ;;  %2759 = vmatprep.mubr.bf16.mxu1 %v1773_v23  ;;  %v4183_v23 = vld [vmem:[#allocation7 + $0x2e8] ss:$16 sps:$4 sm:$0xff]   ;;  %v4221_v45 = vld [vmem:[#allocation7 + $0x3ac] ss:$16 sps:$4 sm:$0xff]   ;;  %v4216_v46 = vld [vmem:[#allocation7 + $0x3a0] ss:$16 sps:$4 sm:$0xff]  }
 0x205   :  { %2627 = vmatprep.subr.bf16.mxu0 %v4158_v3  ;;  %2733 = vmatprep.subr.bf16.mxu1 %v4161_v4  ;;  %v4219_v47 = vld [vmem:[#allocation7 + $0x3a8] ss:$16 sps:$4 sm:$0xff]   ;;  %v4224_v48 = vld [vmem:[#allocation7 + $0x3c4] ss:$16 sps:$4 sm:$0xff]   ;;  %v4227_v49 = vld [vmem:[#allocation7 + $0x3cc] ss:$16 sps:$4 sm:$0xff]  }
 0x206   :  { %v4222_v53 = vld [vmem:[#allocation7 + $0x3c0] ss:$16 sps:$4 sm:$0xff]   ;;  %v4225_v60 = vld [vmem:[#allocation7 + $0x3c8] ss:$16 sps:$4 sm:$0xff]   ;;  %v4230_v56 = vld [vmem:[#allocation7 + $0x3e4] ss:$16 sps:$4 sm:$0xff]  }
 0x207   :  { %2628 = vmatpush1.bf16.msra.mxu0 %v4156_v5  ;;  %2734 = vmatpush1.bf16.msra.mxu1 %v4159_v6  ;;  %v4233_v57 = vld [vmem:[#allocation7 + $0x3ec] ss:$16 sps:$4 sm:$0xff]   ;;  %v4228_v61 = vld [vmem:[#allocation7 + $0x3e0] ss:$16 sps:$4 sm:$0xff]   ;;  %v4231_v62 = vld [vmem:[#allocation7 + $0x3e8] ss:$16 sps:$4 sm:$0xff]  }
 0x208   :  { %2629 = vmatprep.subr.bf16.mxu0 %v4164_v7  ;;  %2735 = vmatprep.subr.bf16.mxu1 %v4167_v8  ;;  %v4234_v63 = vld [vmem:[#allocation8 + $0x40] sm:$0xff]   ;;  %v4238_v3 = vld [vmem:[#allocation8 + $0x48] sm:$0xff]   ;;  %v4242_v7 = vld [vmem:[#allocation8 + $0x50] sm:$0xff]  }
 0x209   :  { %v4235_v58 = vld [vmem:[#allocation8 + $0xc0] sm:$0xff]   ;;  %v4239_v4 = vld [vmem:[#allocation8 + $0xc8] sm:$0xff]   ;;  %v4243_v8 = vld [vmem:[#allocation8 + $0xd0] sm:$0xff]  }
 0x20a   :  { %v4236_v1 = vld [vmem:[#allocation8] sm:$0xff]   ;;  %v4240_v5 = vld [vmem:[#allocation8 + $0x8] sm:$0xff]  }
 0x20b   :  { %2630 = vmatpush1.bf16.msra.mxu0 %v4162_v9  ;;  %2736 = vmatpush1.bf16.msra.mxu1 %v4165_v10  ;;  %v4237_v2 = vld [vmem:[#allocation8 + $0x80] sm:$0xff]   ;;  %v4241_v6 = vld [vmem:[#allocation8 + $0x88] sm:$0xff]   ;;  %v4244_v9 = vld [vmem:[#allocation8 + $0x10] sm:$0xff]  }
 0x20c   :  { %2631 = vmatprep.subr.bf16.mxu0 %v4170_v11  ;;  %2737 = vmatprep.subr.bf16.mxu1 %v4173_v12  ;;  %v4245_v10 = vld [vmem:[#allocation8 + $0x90] sm:$0xff]   ;;  %v4246_v11 = vld [vmem:[#allocation8 + $0x58] sm:$0xff]  }
 0x20d   :  { %v4249_v12 = vld [vmem:[#allocation8 + $0x98] sm:$0xff]  }
 0x20f   :  { %2632 = vmatpush1.bf16.msra.mxu0 %v4168_v13  ;;  %2738 = vmatpush1.bf16.msra.mxu1 %v4171_v14  ;;  %v4250_v13 = vld [vmem:[#allocation8 + $0x60] sm:$0xff]  }
 0x210   :  { %2633 = vmatprep.subr.bf16.mxu0 %v4176_v15  ;;  %2739 = vmatprep.subr.bf16.mxu1 %v4179_v16  ;;  %v4251_v14 = vld [vmem:[#allocation8 + $0xe0] sm:$0xff]  }
 0x211   :  { %v4252_v15 = vld [vmem:[#allocation8 + $0x20] sm:$0xff]  }
 0x212   :  { %v4253_v16 = vld [vmem:[#allocation8 + $0xa0] sm:$0xff]  }
 0x213   :  { %2634 = vmatpush1.bf16.msra.mxu0 %v4174_v17  ;;  %2740 = vmatpush1.bf16.msra.mxu1 %v4177_v18  ;;  %v4254_v17 = vld [vmem:[#allocation8 + $0x68] sm:$0xff]  }
 0x214   :  { %2635 = vmatprep.subr.bf16.mxu0 %v4182_v19  ;;  %2741 = vmatprep.subr.bf16.mxu1 %v4185_v20  ;;  %v4255_v18 = vld [vmem:[#allocation8 + $0xe8] sm:$0xff]   ;;  %v4258_v20 = vld [vmem:[#allocation8 + $0x70] sm:$0xff]  }
 0x215   :  { %v4257_v19 = vld [vmem:[#allocation8 + $0xa8] sm:$0xff]  }
 0x217   :  { %2636 = vmatpush1.bf16.msra.mxu0 %v4180_v22  ;;  %2742 = vmatpush1.bf16.msra.mxu1 %v4183_v23  ;;  %v4259_v22 = vld [vmem:[#allocation8 + $0xf0] sm:$0xff]  }
 0x218   :  { %2637 = vmatprep.subr.bf16.mxu0 %v4188_v24  ;;  %2743 = vmatprep.subr.bf16.mxu1 %v4191_v25  ;;  %v4260_v23 = vld [vmem:[#allocation8 + $0x30] sm:$0xff]   ;;  %v4262_v25 = vld [vmem:[#allocation8 + $0x78] sm:$0xff]  }
 0x219   :  { %v4261_v24 = vld [vmem:[#allocation8 + $0xb0] sm:$0xff]  }
 0x21b   :  { %2638 = vmatpush1.bf16.msra.mxu0 %v4186_v26  ;;  %2744 = vmatpush1.bf16.msra.mxu1 %v4189_v27  ;;  %v4263_v26 = vld [vmem:[#allocation8 + $0xf8] sm:$0xff]  }
 0x21c   :  { %2639 = vmatprep.subr.bf16.mxu0 %v4194_v28  ;;  %2745 = vmatprep.subr.bf16.mxu1 %v4197_v29  ;;  %v4264_v27 = vld [vmem:[#allocation8 + $0x38] sm:$0xff]   ;;  %v1906_v29 = vld [vmem:[%s4566_s4] sm:$0xf] }
 0x21d   :  { %v4265_v28 = vld [vmem:[#allocation8 + $0xb8] sm:$0xff]  }
 0x21f   :  { %2640 = vmatpush1.bf16.msra.mxu0 %v4192_v30  ;;  %2746 = vmatpush1.bf16.msra.mxu1 %v4195_v31  ;;  %v1911_v30 = vrot.slane %v1906_v29, %v325_v51  ;;  %v1919_v31 = vrot.slane %v1906_v29, %v333_v52 }
 0x220   :  { %2641 = vmatprep.subr.bf16.mxu0 %v4200_v32  ;;  %2747 = vmatprep.subr.bf16.mxu1 %v4203_v33  ;;  %v1915_v32 = vrot.slane %v1906_v29, %v329_v54  ;;  %v1923_v33 = vrot.slane %v1906_v29, %v337_v55 }
 0x223   :  { %2642 = vmatpush1.bf16.msra.mxu0 %v4198_v34  ;;  %2748 = vmatpush1.bf16.msra.mxu1 %v4201_v35 }
 0x224   :  { %2643 = vmatprep.subr.bf16.mxu0 %v4206_v36  ;;  %2749 = vmatprep.subr.bf16.mxu1 %v4209_v37 }
 0x227   :  { %2644 = vmatpush1.bf16.msra.mxu0 %v4204_v38  ;;  %2750 = vmatpush1.bf16.msra.mxu1 %v4207_v39 }
 0x228   :  { %2645 = vmatprep.subr.bf16.mxu0 %v4212_v40  ;;  %2751 = vmatprep.subr.bf16.mxu1 %v4215_v41 }
 0x22b   :  { %2646 = vmatpush1.bf16.msra.mxu0 %v4210_v42  ;;  %2752 = vmatpush1.bf16.msra.mxu1 %v4213_v43 }
 0x22c   :  { %2647 = vmatprep.subr.bf16.mxu0 %v4218_v44  ;;  %2753 = vmatprep.subr.bf16.mxu1 %v4221_v45 }
 0x22f   :  { %2648 = vmatpush1.bf16.msra.mxu0 %v4216_v46  ;;  %2754 = vmatpush1.bf16.msra.mxu1 %v4219_v47 }
 0x230   :  { %2649 = vmatprep.subr.bf16.mxu0 %v4224_v48  ;;  %2755 = vmatprep.subr.bf16.mxu1 %v4227_v49 }
 0x233   :  { %2650 = vmatpush1.bf16.msra.mxu0 %v4222_v53  ;;  %2756 = vmatpush1.bf16.msra.mxu1 %v4225_v60 }
 0x234   :  { %2651 = vmatprep.subr.bf16.mxu0 %v4230_v56  ;;  %2757 = vmatprep.subr.bf16.mxu1 %v4233_v57 }
 0x237   :  { %2652 = vmatpush1.bf16.msra.mxu0 %v4228_v61  ;;  %2758 = vmatpush1.bf16.msra.mxu1 %v4231_v62 }
 0x238   :  { %3584 = vmatprep.subr.bf16.mxu0 %v4234_v63  ;;  %3612 = vmatprep.subr.bf16.mxu1 %v4235_v58 }
 0x23a   :  { %2654 = vmatmul.mubr.bf16.vlgmr.msra.gmra.mrb[8].mxu0 %v4521_v21  ;;  %2760 = vmatmul.mubr.bf16.vlgmr.msra.gmra.mrb[8].mxu1 %v4521_v21  ;;  %v4247_v21 = vld [vmem:[#allocation8 + $0xd8] sm:$0xff]  }
 0x23b   :  { %2663 = vmatprep.mubr.bf16.mxu0 %v4525_v59  ;;  %2769 = vmatprep.mubr.bf16.mxu1 %v4525_v59  ;;  %v4248_v59 = vld [vmem:[#allocation8 + $0x18] sm:$0xff]  }
 0x23c   :  { %3585 = vmatpush3.bf16.msra.mxu0 %v4236_v1  ;;  %3613 = vmatpush3.bf16.msra.mxu1 %v4237_v2 }
 0x23d   :  { %3586 = vmatprep.subr.bf16.mxu0 %v4238_v3  ;;  %3614 = vmatprep.subr.bf16.mxu1 %v4239_v4 }
 0x240   :  { %3587 = vmatpush3.bf16.msra.mxu0 %v4240_v5  ;;  %3615 = vmatpush3.bf16.msra.mxu1 %v4241_v6 }
 0x241   :  { %3588 = vmatprep.subr.bf16.mxu0 %v4242_v7  ;;  %3616 = vmatprep.subr.bf16.mxu1 %v4243_v8 }
 0x242   :  { %2664 = vmatmul.mubr.bf16.gmra.mrb[12].mxu0 %v4523_v0  ;;  %2770 = vmatmul.mubr.bf16.gmra.mrb[12].mxu1 %v4523_v0  ;;  %v4256_v0 = vld [vmem:[#allocation8 + $0x28] sm:$0xff]  }
 0x244   :  { %3589 = vmatpush3.bf16.msra.mxu0 %v4244_v9  ;;  %3617 = vmatpush3.bf16.msra.mxu1 %v4245_v10 }
 0x245   :  { %3590 = vmatprep.subr.bf16.mxu0 %v4246_v11  ;;  %3618 = vmatprep.subr.bf16.mxu1 %v4247_v21 }
 0x248   :  { %3591 = vmatpush3.bf16.msra.mxu0 %v4248_v59  ;;  %3619 = vmatpush3.bf16.msra.mxu1 %v4249_v12 }
 0x249   :  { %3592 = vmatprep.subr.bf16.mxu0 %v4250_v13  ;;  %3620 = vmatprep.subr.bf16.mxu1 %v4251_v14 }
 0x24c   :  { %3593 = vmatpush3.bf16.msra.mxu0 %v4252_v15  ;;  %3621 = vmatpush3.bf16.msra.mxu1 %v4253_v16 }
 0x24d   :  { %3594 = vmatprep.subr.bf16.mxu0 %v4254_v17  ;;  %3622 = vmatprep.subr.bf16.mxu1 %v4255_v18 }
 0x250   :  { %3595 = vmatpush3.bf16.msra.mxu0 %v4256_v0  ;;  %3623 = vmatpush3.bf16.msra.mxu1 %v4257_v19 }
 0x251   :  { %3596 = vmatprep.subr.bf16.mxu0 %v4258_v20  ;;  %3624 = vmatprep.subr.bf16.mxu1 %v4259_v22 }
 0x254   :  { %3597 = vmatpush3.bf16.msra.mxu0 %v4260_v23  ;;  %3625 = vmatpush3.bf16.msra.mxu1 %v4261_v24 }
 0x255   :  { %3598 = vmatprep.subr.bf16.mxu0 %v4262_v25  ;;  %3626 = vmatprep.subr.bf16.mxu1 %v4263_v26 }
 0x258   :  { %3599 = vmatpush3.bf16.msra.mxu0 %v4264_v27  ;;  %3627 = vmatpush3.bf16.msra.mxu1 %v4265_v28  ;;  %v3532_v28 = vld [vmem:[%s4568_s6] ss:$0 sm:$0xff]  ;;  %s4395_s6 = smov [#allocation10]  }
 0x259   :  { %s3190_s8 = sshll.u32 %s4395_s6, 4  ;;  %s3191_s8 = int_to_ptr.vmem [resolvable:$true] %s3190_s8 }
 0x25a   :  { %s4354_s9 = scalar_lea.vmem %s3191_s8, 256  ;;  %p4359_p5 = scmp.lt.s32.totalorder %s3191_s8, %s3191_s8 }
 0x25b   :  { %p4355_p4 = scmp.ne.s32.totalorder %s3191_s8, %s4354_s9  ;;  %p4360_p6 = scmp.lt.s32.totalorder %s4354_s9, %s4354_s9 }
 0x25d   :  { %p4361_p7 = por %p4360_p6, %p4359_p5 }
 0x25f   :  { %p4362_p8 = pnand %p4361_p7, %p4355_p4 }
 0x30d   :  { %v2655_v34 = vpop.f32.mrb[8].mxu0  ;;  %v2761_v35 = vpop.f32.mrb[8].mxu1 }
 0x30e   :  { %v3656_v36 = vadd.f32 %v2655_v34, %v1911_v30  ;;  %v3664_v37 = vadd.f32 %v2761_v35, %v1919_v31  ;;  %v2657_v38 = vpop.f32.mrb[9].mxu0  ;;  %v2763_v39 = vpop.f32.mrb[9].mxu1 }
 0x30f   :  { %v3657_v40 = vadd.f32 %v2657_v38, %v1915_v32  ;;  %v3665_v41 = vadd.f32 %v2763_v39, %v1923_v33  ;;  %v2659_v42 = vpop.f32.mrb[10].mxu0  ;;  %v2765_v43 = vpop.f32.mrb[10].mxu1 }
 0x310   :  { %v3658_v51 = vadd.f32 %v2659_v42, %v1911_v30  ;;  %v3666_v44 = vadd.f32 %v2765_v43, %v1919_v31  ;;  %v2661_v45 = vpop.f32.mrb[11].mxu0  ;;  %v2767_v52 = vpop.f32.mrb[11].mxu1  ;;  %v2780_v54 = vmax.f32 %v3656_v36, 0.0  ;;  %v2782_v48 = vmax.f32 %v3664_v37, 0.0 }
 0x311   :  { %v3659_v46 = vadd.f32 %v2661_v45, %v1915_v32  ;;  %v3667_v47 = vadd.f32 %v2767_v52, %v1923_v33  ;;  %v2781_v49 = vmax.f32 %v3657_v40, 0.0  ;;  %v2783_v53 = vmax.f32 %v3665_v41, 0.0 }
 0x312   :  { %v2784_v50 = vmax.f32 %v3658_v51, 0.0  ;;  %v2786_v55 = vmax.f32 %v3666_v44, 0.0 }
 0x313   :  { %v2785_v60 = vmax.f32 %v3659_v46, 0.0  ;;  %v2787_v56 = vmax.f32 %v3667_v47, 0.0 }
 0x314   :  { %v2796_v57 = vpack.c.bf16 %v2784_v50, %v2780_v54  ;;  %v2798_v61 = vpack.c.bf16 %v2786_v55, %v2782_v48 }
 0x315   :  { %v2797_v62 = vpack.c.bf16 %v2785_v60, %v2781_v49  ;;  %v2799_v63 = vpack.c.bf16 %v2787_v56, %v2783_v53  ;;  %v2665_v58 = vpop.f32.mrb[12].mxu0  ;;  %v2771_v1 = vpop.f32.mrb[12].mxu1 }
 0x316   :  { %v3660_v2 = vadd.f32 %v2665_v58, %v1911_v30  ;;  %v3668_v3 = vadd.f32 %v2771_v1, %v1919_v31  ;;  %v2667_v4 = vpop.f32.mrb[13].mxu0  ;;  %v2773_v5 = vpop.f32.mrb[13].mxu1 }
 0x317   :  { %v3661_v6 = vadd.f32 %v2667_v4, %v1915_v32  ;;  %v3669_v7 = vadd.f32 %v2773_v5, %v1923_v33  ;;  %v2669_v8 = vpop.f32.mrb[14].mxu0  ;;  %v2775_v9 = vpop.f32.mrb[14].mxu1  ;;  %3099 = vmatprep.mubr.bf16.mxu0 %v2797_v62  ;;  %3148 = vmatprep.mubr.bf16.mxu1 %v2799_v63 }
 0x318   :  { %v3662_v10 = vadd.f32 %v2669_v8, %v1911_v30  ;;  %v3670_v11 = vadd.f32 %v2775_v9, %v1919_v31  ;;  %v2671_v21 = vpop.f32.mrb[15].mxu0  ;;  %v2777_v59 = vpop.f32.mrb[15].mxu1  ;;  %3100 = vmatmul.mubr.bf16.vlgmr.msra.gmra.mrb[16].mxu0 %v2796_v57  ;;  %3149 = vmatmul.mubr.bf16.vlgmr.msra.gmra.mrb[16].mxu1 %v2798_v61  ;;  %v2788_v14 = vmax.f32 %v3660_v2, 0.0  ;;  %v2790_v15 = vmax.f32 %v3668_v3, 0.0 }
 0x319   :  { %v3663_v12 = vadd.f32 %v2671_v21, %v1915_v32  ;;  %v3671_v13 = vadd.f32 %v2777_v59, %v1923_v33  ;;  %v2789_v18 = vmax.f32 %v3661_v6, 0.0  ;;  %v2791_v0 = vmax.f32 %v3669_v7, 0.0 }
 0x31a   :  { %v2792_v16 = vmax.f32 %v3662_v10, 0.0  ;;  %v2794_v17 = vmax.f32 %v3670_v11, 0.0 }
 0x31b   :  { %v2793_v19 = vmax.f32 %v3663_v12, 0.0  ;;  %v2795_v20 = vmax.f32 %v3671_v13, 0.0 }
 0x31c   :  { %v2800_v22 = vpack.c.bf16 %v2792_v16, %v2788_v14  ;;  %v2802_v23 = vpack.c.bf16 %v2794_v17, %v2790_v15 }
 0x31d   :  { %v2801_v24 = vpack.c.bf16 %v2793_v19, %v2789_v18  ;;  %v2803_v25 = vpack.c.bf16 %v2795_v20, %v2791_v0 }
 0x31f   :  { %3107 = vmatprep.mubr.bf16.mxu0 %v2801_v24  ;;  %3156 = vmatprep.mubr.bf16.mxu1 %v2803_v25 }
 0x320   :  { %3108 = vmatmul.mubr.bf16.gmra.mrb[20].mxu0 %v2800_v22  ;;  %3157 = vmatmul.mubr.bf16.gmra.mrb[20].mxu1 %v2802_v23 }
 0x3eb   :  { %v3600_v26 = vpop.f32.mrb[16].mxu0  ;;  %v3628_v27 = vpop.f32.mrb[16].mxu1 }
 0x3ec   :  { %v3601_v29 = vpop.f32.mrb[17].mxu0  ;;  %v3629_v30 = vpop.f32.mrb[17].mxu1 }
 0x3ed   :  { %v3602_v31 = vadd.f32 %v3601_v29, %v3600_v26  ;;  %v3630_v32 = vadd.f32 %v3629_v30, %v3628_v27  ;;  %v3603_v33 = vpop.f32.mrb[18].mxu0  ;;  %v3631_v34 = vpop.f32.mrb[18].mxu1 }
 0x3ee   :  { %v3604_v35 = vpop.f32.mrb[19].mxu0  ;;  %v3632_v36 = vpop.f32.mrb[19].mxu1 }
 0x3ef   :  { %v3102_v37 = vadd.f32 %v3602_v31, %v3532_v28  ;;  %v3605_v38 = vadd.f32 %v3604_v35, %v3603_v33  ;;  %v3633_v39 = vadd.f32 %v3632_v36, %v3631_v34 }
 0x3f1   :  { %v3151_v40 = vadd.f32 %v3630_v32, %v3102_v37  ;;  %v3105_v41 = vadd.f32 %v3605_v38, %v3532_v28 }
 0x3f3   :  { %v3154_v42 = vadd.f32 %v3633_v39, %v3105_v41  ;;  %v3606_v43 = vpop.f32.mrb[20].mxu0  ;;  %v3634_v51 = vpop.f32.mrb[20].mxu1 }
 0x3f4   :  { %v3607_v44 = vpop.f32.mrb[21].mxu0  ;;  %v3635_v45 = vpop.f32.mrb[21].mxu1 }
 0x3f5   :  { %v3576_v52 = vpack.c.bf16 %v3154_v42, %v3151_v40  ;;  %v3608_v46 = vadd.f32 %v3607_v44, %v3606_v43  ;;  %v3636_v47 = vadd.f32 %v3635_v45, %v3634_v51  ;;  %v3609_v54 = vpop.f32.mrb[22].mxu0  ;;  %v3637_v48 = vpop.f32.mrb[22].mxu1 }
 0x3f6   :  { %v3610_v50 = vpop.f32.mrb[23].mxu0  ;;  %v3638_v55 = vpop.f32.mrb[23].mxu1 }
 0x3f7   :  { %3577 = vst [vmem:[#allocation10] sm:$0xff] %v3576_v52   ;;  %v3110_v49 = vadd.f32 %v3608_v46, %v3532_v28  ;;  %v3611_v53 = vadd.f32 %v3610_v50, %v3609_v54  ;;  %v3639_v60 = vadd.f32 %v3638_v55, %v3637_v48 }
 0x3f9   :  { %v3159_v56 = vadd.f32 %v3636_v47, %v3110_v49  ;;  %v3113_v57 = vadd.f32 %v3611_v53, %v3532_v28 }
 0x3fb   :  { %v3162_v61 = vadd.f32 %v3639_v60, %v3113_v57 }
 0x3fd   :  { %v3581_v62 = vpack.c.bf16 %v3162_v61, %v3159_v56 }
 0x3ff   :  { %3583 = vst [vmem:[#allocation10 + $0x8] sm:$0xff] %v3581_v62  }
 0x400   :  { %4365 = shalt.err (!%p4362_p8)
}
 0x401   :  { %s4366_s14 = scalar_lea.hbm %s4569_s7, 256 }
 0x402   :  { %p4367_p9 = scmp.ne.s32.totalorder %s4569_s7, %s4366_s14  ;;  %p4370_p10 = scmp.lt.u32.totalorder %s4366_s14, %s4569_s7 }
 0x404   :  { %p4372_p11 = pnand %p4370_p10, %p4367_p9 }
 0x406   :  { %4375 = shalt.err (!%p4372_p11)
}
 0x407   :  { %3196 = dma.vmem_to_hbm [thread:$0]  %s3191_s8, 256, %s4569_s7, [#allocation4], %s4392_s3, %s4392_s3, %s4393_s11  }
 0x408   :  { %4382 = dma.done.wait [#allocation4], 256  }
 0x409   :  { %4383 = vsyncadd [#allocation4], 4294967040 }
 0x40a   :  { %3200 = vsyncpa [#allocation3], 1 }
 0x40b   :  { %3201 = vsyncpa [#allocation6], 1 }
 0x40c   :  { %3202 = vsyncpa [#allocation9], 1 }
 0x40d   :  { %3203 = vsyncpa [#allocation4], 1 }

</bundles_post_ra>
